<compile_context>
chip_gen: v7x
topology: tpu7x:2x2x1
jax: 0.10.0
libtpu: 0.0.40
codegen_flags: <defaults>
</compile_context>

<pallas_src>
import jax
import jax.numpy as jnp
from jax import lax
from jax.experimental import pallas as pl
from jax.experimental.pallas import tpu as pltpu


def _make_kernel(H, W, Cin, CPAD):
    HW = H * W

    def kernel(x_ref, wdw_ref, b1_ref, wft_ref, bf_ref, o_ref):
        # ReLU0 on the channel-major (Cin, H*W) slab (fully lane-dense).
        x = jnp.maximum(x_ref[0], 0.0)

        # Boundary-validity masks for the flattened-spatial rolls.  Built once
        # per grid step from a tiny (1, HW) iota; broadcast over Cin sublanes
        # at the select.
        col = lax.broadcasted_iota(jnp.int32, (1, HW), 1)
        wq = col % W
        h_ok = {-1: col >= W, 0: None, 1: col < HW - W}
        w_ok = {-1: wq >= 1, 0: None, 1: wq <= W - 2}

        # Depthwise 3x3 (SAME, zero pad) as 9 lane-rolls + masked FMAs.
        # Tap (kh, kw) multiplies x shifted by (dh, dw) = (kh-1, kw-1);
        # taps are (Cin, 1) columns of wdw_ref (BN1 scale pre-folded),
        # lane-broadcast at the multiply.
        acc = x * wdw_ref[:, 4:5]                      # centre tap (kh=kw=1)
        for kh in range(3):
            for kw in range(3):
                dh, dw = kh - 1, kw - 1
                if dh == 0 and dw == 0:
                    continue
                shift = (-(dh * W + dw)) % HW          # out[i] = x[i + dh*W + dw]
                xr = pltpu.roll(x, shift=shift, axis=1)
                m = h_ok[dh]
                if w_ok[dw] is not None:
                    m = w_ok[dw] if m is None else (m & w_ok[dw])
                xr = jnp.where(m, xr, 0.0)             # zero the wrapped reads
                k = kh * 3 + kw
                acc = acc + xr * wdw_ref[:, k:k + 1]

        # BN1 shift (scale already folded into the taps) + ReLU1.
        y = jnp.maximum(acc + b1_ref[...], 0.0)        # (Cin, HW)

        # Fused conv2*BN2*conv3 as one channel-major matmul:
        #   (CPAD, Cin) @ (Cin, HW) -> (CPAD, HW)
        # Output is already channel major => single unmasked lane-dense store,
        # no transpose anywhere.
        o_ref[0, :, :] = (
            jnp.dot(wft_ref[...], y, preferred_element_type=jnp.float32)
            + bf_ref[...])

    return kernel


def fused_forward(x_nchw, wdw9, s1, b1, w2, s2, b2, w3):
    """x_nchw: (N, 40, H, W) f32 -> (N, 72, H, W) f32.

    wdw9: (9, Cin) depthwise taps (row = kh*3+kw); s1/b1, s2/b2: folded BN
    scale/shift (inference mode), shape (1, C); w2: (Cin, Cmid); w3: (Cmid, Cout).
    """
    N, Cin, H, W = x_nchw.shape
    Cout = w3.shape[1]
    CPAD = ((Cout + 127) // 128) * 128
    HW = H * W

    # ---- host-side algebraic folding (all linear between the two ReLUs) ----
    wdw_cm = (wdw9 * s1).T.astype(jnp.float32)              # (Cin, 9), BN1 scale in taps
    b1_cm = b1.reshape(Cin, 1).astype(jnp.float32)          # (Cin, 1), BN1 shift
    w_fused = ((w2 * s2) @ w3).astype(jnp.float32)          # (Cin, Cout)
    b_fused = (b2 @ w3).astype(jnp.float32)                 # (1, Cout)
    wft = jnp.zeros((CPAD, Cin), jnp.float32).at[:Cout, :].set(w_fused.T)
    bfp = jnp.zeros((CPAD, 1), jnp.float32).at[:Cout, 0].set(b_fused[0])

    # NCHW is already channel-major: flattening H,W is a free reshape,
    # no input transpose pass.
    x_cm = x_nchw.reshape(N, Cin, HW)

    out_cm = pl.pallas_call(
        _make_kernel(H, W, Cin, CPAD),
        out_shape=jax.ShapeDtypeStruct((N, CPAD, HW), jnp.float32),
        grid_spec=pltpu.PrefetchScalarGridSpec(
            num_scalar_prefetch=0,
            grid=(N,),
            in_specs=[
                pl.BlockSpec((1, Cin, HW), lambda n: (n, 0, 0)),
                pl.BlockSpec((Cin, 9), lambda n: (0, 0)),
                pl.BlockSpec((Cin, 1), lambda n: (0, 0)),
                pl.BlockSpec((CPAD, Cin), lambda n: (0, 0)),
                pl.BlockSpec((CPAD, 1), lambda n: (0, 0)),
            ],
            out_specs=pl.BlockSpec((1, CPAD, HW), lambda n: (n, 0, 0)),
        ),
        compiler_params=pltpu.CompilerParams(
            dimension_semantics=("parallel",)),
    )(x_cm, wdw_cm, b1_cm, wft, bfp)

    # Contiguous channel slice + free reshape (no NHWC->NCHW transpose pass).
    return out_cm[:, :Cout, :].reshape(N, Cout, H, W)


def _reference(x_nchw, wdw9, s1, b1, w2, s2, b2, w3):
    """Pure-JAX reference (lax.conv, unfused params) for validation."""
    Cin = wdw9.shape[1]
    x = jnp.transpose(x_nchw, (0, 2, 3, 1))
    x = jnp.maximum(x, 0.0)
    dn = jax.lax.conv_dimension_numbers(x.shape, (3, 3, 1, Cin),
                                        ('NHWC', 'HWIO', 'NHWC'))
    w_dw = wdw9.reshape(3, 3, 1, Cin)
    y = jax.lax.conv_general_dilated(x, w_dw, (1, 1), 'SAME',
                                     dimension_numbers=dn,
                                     feature_group_count=Cin)
    y = jnp.maximum(y * s1[0] + b1[0], 0.0)
    y = jnp.einsum('nhwc,cd->nhwd', y, w2) * s2[0] + b2[0]
    y = jnp.einsum('nhwc,cd->nhwd', y, w3)
    return jnp.transpose(y, (0, 3, 1, 2))


if __name__ == "__main__":
    key = jax.random.PRNGKey(0)
    ks = jax.random.split(key, 12)

    N, Cin, Cmid, Cout, H, W = 2, 40, 24, 72, 16, 16

    # Input (NCHW, matching the PyTorch module's convention, small spatial).
    x = jax.random.normal(ks[0], (N, Cin, H, W), jnp.float32)

    # Depthwise conv weight: torch shape (40,1,3,3) -> (kh, kw, C) -> (9, C).
    w_dw_t = jax.random.normal(ks[1], (Cin, 1, 3, 3), jnp.float32) * 0.2
    wdw9 = jnp.transpose(w_dw_t[:, 0], (1, 2, 0)).reshape(9, Cin)

    # BatchNorm2d(40) params (inference mode, folded into scale/shift).
    g1 = 1.0 + 0.1 * jax.random.normal(ks[2], (Cin,), jnp.float32)
    be1 = 0.1 * jax.random.normal(ks[3], (Cin,), jnp.float32)
    m1 = 0.1 * jax.random.normal(ks[4], (Cin,), jnp.float32)
    v1 = jnp.abs(jax.random.normal(ks[5], (Cin,), jnp.float32)) + 0.5
    s1 = (g1 / jnp.sqrt(v1 + 1e-5)).reshape(1, Cin)
    b1 = (be1 - m1 * g1 / jnp.sqrt(v1 + 1e-5)).reshape(1, Cin)

    # 1x1 conv 40->24: torch weight (24,40,1,1) -> (40,24).
    w2_t = jax.random.normal(ks[6], (Cmid, Cin), jnp.float32) * 0.1
    w2 = jnp.transpose(w2_t)

    # BatchNorm2d(24).
    g2 = 1.0 + 0.1 * jax.random.normal(ks[7], (Cmid,), jnp.float32)
    be2 = 0.1 * jax.random.normal(ks[8], (Cmid,), jnp.float32)
    m2 = 0.1 * jax.random.normal(ks[9], (Cmid,), jnp.float32)
    v2 = jnp.abs(jax.random.normal(ks[10], (Cmid,), jnp.float32)) + 0.5
    s2 = (g2 / jnp.sqrt(v2 + 1e-5)).reshape(1, Cmid)
    b2 = (be2 - m2 * g2 / jnp.sqrt(v2 + 1e-5)).reshape(1, Cmid)

    # 1x1 conv 24->72: torch weight (72,24,1,1) -> (24,72).
    w3_t = jax.random.normal(ks[11], (Cout, Cmid), jnp.float32) * 0.1
    w3 = jnp.transpose(w3_t)

    out = fused_forward(x, wdw9, s1, b1, w2, s2, b2, w3)
    out = jax.block_until_ready(out)

    ref = jax.block_until_ready(_reference(x, wdw9, s1, b1, w2, s2, b2, w3))
    assert out.shape == (N, Cout, H, W), out.shape
    assert jnp.allclose(out, ref, rtol=1e-4, atol=1e-4), float(
        jnp.max(jnp.abs(out - ref)))

    print("KERNEL_OK")
</pallas_src>

<mosaic_0001>
module attributes {stable_mosaic.version = 11 : i64} {
  func.func @kernel(%arg0: i32, %arg1: memref<1x40x256xf32, #tpu.memory_space<vmem>>, %arg2: memref<40x9xf32, #tpu.memory_space<vmem>>, %arg3: memref<40x1xf32, #tpu.memory_space<vmem>>, %arg4: memref<128x40xf32, #tpu.memory_space<vmem>>, %arg5: memref<128x1xf32, #tpu.memory_space<vmem>>, %arg6: memref<1x128x256xf32, #tpu.memory_space<vmem>>) attributes {dimension_semantics = [#tpu.dimension_semantics<parallel>], iteration_bounds = array<i64: 2>, scalar_prefetch = 0 : i64, scratch_operands = 0 : i64, tpu.core_type = #tpu.core_type<tc>, window_params = [{transform_indices = @transform_0, window_bounds = array<i64: 1, 40, 256>}, {pipeline_mode = #tpu.pipeline_mode<synchronous>, transform_indices = @transform_1, window_bounds = array<i64: 40, 9>}, {pipeline_mode = #tpu.pipeline_mode<synchronous>, transform_indices = @transform_2, window_bounds = array<i64: 40, 1>}, {pipeline_mode = #tpu.pipeline_mode<synchronous>, transform_indices = @transform_3, window_bounds = array<i64: 128, 40>}, {pipeline_mode = #tpu.pipeline_mode<synchronous>, transform_indices = @transform_4, window_bounds = array<i64: 128, 1>}, {transform_indices = @transform_5, window_bounds = array<i64: 1, 128, 256>}]} {
    %c0 = arith.constant 0 : index
    %c0_0 = arith.constant 0 : index
    %c0_1 = arith.constant 0 : index
    %0 = vector.load %arg1[%c0, %c0_0, %c0_1] : memref<1x40x256xf32, #tpu.memory_space<vmem>>, vector<1x40x256xf32>
    %1 = vector.shape_cast %0 : vector<1x40x256xf32> to vector<40x256xf32>
    %cst = arith.constant 0.000000e+00 : f32
    %2 = vector.broadcast %cst : f32 to vector<40x256xf32>
    %3 = arith.maximumf %1, %2 : vector<40x256xf32>
    %4 = tpu.iota {dimensions = array<i32: 1>} : vector<1x256xi32>
    %c16_i32 = arith.constant 16 : i32
    %c0_i32 = arith.constant 0 : i32
    %5 = arith.cmpi eq, %c16_i32, %c0_i32 : i32
    %c1_i32 = arith.constant 1 : i32
    %6 = arith.select %5, %c1_i32, %c16_i32 : i32
    %7 = vector.broadcast %6 : i32 to vector<1x256xi32>
    %8 = arith.remsi %4, %7 : vector<1x256xi32>
    %c0_i32_2 = arith.constant 0 : i32
    %9 = vector.broadcast %c0_i32_2 : i32 to vector<1x256xi32>
    %10 = arith.cmpi ne, %8, %9 : vector<1x256xi32>
    %c0_i32_3 = arith.constant 0 : i32
    %11 = vector.broadcast %c0_i32_3 : i32 to vector<1x256xi32>
    %12 = arith.cmpi slt, %8, %11 : vector<1x256xi32>
    %c0_i32_4 = arith.constant 0 : i32
    %13 = arith.cmpi slt, %6, %c0_i32_4 : i32
    %14 = vector.broadcast %13 : i1 to vector<1x256xi1>
    %15 = vector.broadcast %14 : vector<1x256xi1> to vector<1x256xi1>
    %16 = arith.xori %12, %15 : vector<1x256xi1>
    %17 = arith.andi %16, %10 : vector<1x256xi1>
    %18 = vector.broadcast %6 : i32 to vector<1x256xi32>
    %19 = arith.addi %8, %18 : vector<1x256xi32>
    %20 = arith.select %17, %19, %8 : vector<1x256xi1>, vector<1x256xi32>
    %c16_i32_5 = arith.constant 16 : i32
    %21 = vector.broadcast %c16_i32_5 : i32 to vector<1x256xi32>
    %22 = arith.cmpi sge, %4, %21 : vector<1x256xi32>
    %c240_i32 = arith.constant 240 : i32
    %23 = vector.broadcast %c240_i32 : i32 to vector<1x256xi32>
    %24 = arith.cmpi slt, %4, %23 : vector<1x256xi32>
    %c1_i32_6 = arith.constant 1 : i32
    %25 = vector.broadcast %c1_i32_6 : i32 to vector<1x256xi32>
    %26 = arith.cmpi sge, %20, %25 : vector<1x256xi32>
    %c14_i32 = arith.constant 14 : i32
    %27 = vector.broadcast %c14_i32 : i32 to vector<1x256xi32>
    %28 = arith.cmpi sle, %20, %27 : vector<1x256xi32>
    %c0_7 = arith.constant 0 : index
    %c4 = arith.constant 4 : index
    %29 = vector.load %arg2[%c0_7, %c4] : memref<40x9xf32, #tpu.memory_space<vmem>>, vector<40x1xf32>
    %30 = vector.broadcast %29 : vector<40x1xf32> to vector<40x256xf32>
    %31 = arith.mulf %3, %30 : vector<40x256xf32>
    %c17_i32 = arith.constant 17 : i32
    %32 = tpu.dynamic_rotate %3 by %c17_i32 dim 1 : vector<40x256xf32>, i32 -> vector<40x256xf32>
    %33 = arith.andi %22, %26 : vector<1x256xi1>
    %cst_8 = arith.constant 0.000000e+00 : f32
    %34 = vector.shape_cast %33 : vector<1x256xi1> to vector<1x256xi1>
    %35 = vector.broadcast %34 : vector<1x256xi1> to vector<40x256xi1>
    %36 = vector.broadcast %cst_8 : f32 to vector<40x256xf32>
    %37 = arith.select %35, %32, %36 : vector<40x256xi1>, vector<40x256xf32>
    %c0_9 = arith.constant 0 : index
    %c0_10 = arith.constant 0 : index
    %38 = vector.load %arg2[%c0_9, %c0_10] : memref<40x9xf32, #tpu.memory_space<vmem>>, vector<40x1xf32>
    %39 = vector.broadcast %38 : vector<40x1xf32> to vector<40x256xf32>
    %40 = arith.mulf %37, %39 : vector<40x256xf32>
    %41 = arith.addf %31, %40 : vector<40x256xf32>
    %c16_i32_11 = arith.constant 16 : i32
    %42 = tpu.dynamic_rotate %3 by %c16_i32_11 dim 1 : vector<40x256xf32>, i32 -> vector<40x256xf32>
    %cst_12 = arith.constant 0.000000e+00 : f32
    %43 = vector.shape_cast %22 : vector<1x256xi1> to vector<1x256xi1>
    %44 = vector.broadcast %43 : vector<1x256xi1> to vector<40x256xi1>
    %45 = vector.broadcast %cst_12 : f32 to vector<40x256xf32>
    %46 = arith.select %44, %42, %45 : vector<40x256xi1>, vector<40x256xf32>
    %c0_13 = arith.constant 0 : index
    %c1 = arith.constant 1 : index
    %47 = vector.load %arg2[%c0_13, %c1] : memref<40x9xf32, #tpu.memory_space<vmem>>, vector<40x1xf32>
    %48 = vector.broadcast %47 : vector<40x1xf32> to vector<40x256xf32>
    %49 = arith.mulf %46, %48 : vector<40x256xf32>
    %50 = arith.addf %41, %49 : vector<40x256xf32>
    %c15_i32 = arith.constant 15 : i32
    %51 = tpu.dynamic_rotate %3 by %c15_i32 dim 1 : vector<40x256xf32>, i32 -> vector<40x256xf32>
    %52 = arith.andi %22, %28 : vector<1x256xi1>
    %cst_14 = arith.constant 0.000000e+00 : f32
    %53 = vector.shape_cast %52 : vector<1x256xi1> to vector<1x256xi1>
    %54 = vector.broadcast %53 : vector<1x256xi1> to vector<40x256xi1>
    %55 = vector.broadcast %cst_14 : f32 to vector<40x256xf32>
    %56 = arith.select %54, %51, %55 : vector<40x256xi1>, vector<40x256xf32>
    %c0_15 = arith.constant 0 : index
    %c2 = arith.constant 2 : index
    %57 = vector.load %arg2[%c0_15, %c2] : memref<40x9xf32, #tpu.memory_space<vmem>>, vector<40x1xf32>
    %58 = vector.broadcast %57 : vector<40x1xf32> to vector<40x256xf32>
    %59 = arith.mulf %56, %58 : vector<40x256xf32>
    %60 = arith.addf %50, %59 : vector<40x256xf32>
    %c1_i32_16 = arith.constant 1 : i32
    %61 = tpu.dynamic_rotate %3 by %c1_i32_16 dim 1 : vector<40x256xf32>, i32 -> vector<40x256xf32>
    %cst_17 = arith.constant 0.000000e+00 : f32
    %62 = vector.shape_cast %26 : vector<1x256xi1> to vector<1x256xi1>
    %63 = vector.broadcast %62 : vector<1x256xi1> to vector<40x256xi1>
    %64 = vector.broadcast %cst_17 : f32 to vector<40x256xf32>
    %65 = arith.select %63, %61, %64 : vector<40x256xi1>, vector<40x256xf32>
    %c0_18 = arith.constant 0 : index
    %c3 = arith.constant 3 : index
    %66 = vector.load %arg2[%c0_18, %c3] : memref<40x9xf32, #tpu.memory_space<vmem>>, vector<40x1xf32>
    %67 = vector.broadcast %66 : vector<40x1xf32> to vector<40x256xf32>
    %68 = arith.mulf %65, %67 : vector<40x256xf32>
    %69 = arith.addf %60, %68 : vector<40x256xf32>
    %c255_i32 = arith.constant 255 : i32
    %70 = tpu.dynamic_rotate %3 by %c255_i32 dim 1 : vector<40x256xf32>, i32 -> vector<40x256xf32>
    %cst_19 = arith.constant 0.000000e+00 : f32
    %71 = vector.shape_cast %28 : vector<1x256xi1> to vector<1x256xi1>
    %72 = vector.broadcast %71 : vector<1x256xi1> to vector<40x256xi1>
    %73 = vector.broadcast %cst_19 : f32 to vector<40x256xf32>
    %74 = arith.select %72, %70, %73 : vector<40x256xi1>, vector<40x256xf32>
    %c0_20 = arith.constant 0 : index
    %c5 = arith.constant 5 : index
    %75 = vector.load %arg2[%c0_20, %c5] : memref<40x9xf32, #tpu.memory_space<vmem>>, vector<40x1xf32>
    %76 = vector.broadcast %75 : vector<40x1xf32> to vector<40x256xf32>
    %77 = arith.mulf %74, %76 : vector<40x256xf32>
    %78 = arith.addf %69, %77 : vector<40x256xf32>
    %c241_i32 = arith.constant 241 : i32
    %79 = tpu.dynamic_rotate %3 by %c241_i32 dim 1 : vector<40x256xf32>, i32 -> vector<40x256xf32>
    %80 = arith.andi %24, %26 : vector<1x256xi1>
    %cst_21 = arith.constant 0.000000e+00 : f32
    %81 = vector.shape_cast %80 : vector<1x256xi1> to vector<1x256xi1>
    %82 = vector.broadcast %81 : vector<1x256xi1> to vector<40x256xi1>
    %83 = vector.broadcast %cst_21 : f32 to vector<40x256xf32>
    %84 = arith.select %82, %79, %83 : vector<40x256xi1>, vector<40x256xf32>
    %c0_22 = arith.constant 0 : index
    %c6 = arith.constant 6 : index
    %85 = vector.load %arg2[%c0_22, %c6] : memref<40x9xf32, #tpu.memory_space<vmem>>, vector<40x1xf32>
    %86 = vector.broadcast %85 : vector<40x1xf32> to vector<40x256xf32>
    %87 = arith.mulf %84, %86 : vector<40x256xf32>
    %88 = arith.addf %78, %87 : vector<40x256xf32>
    %c240_i32_23 = arith.constant 240 : i32
    %89 = tpu.dynamic_rotate %3 by %c240_i32_23 dim 1 : vector<40x256xf32>, i32 -> vector<40x256xf32>
    %cst_24 = arith.constant 0.000000e+00 : f32
    %90 = vector.shape_cast %24 : vector<1x256xi1> to vector<1x256xi1>
    %91 = vector.broadcast %90 : vector<1x256xi1> to vector<40x256xi1>
    %92 = vector.broadcast %cst_24 : f32 to vector<40x256xf32>
    %93 = arith.select %91, %89, %92 : vector<40x256xi1>, vector<40x256xf32>
    %c0_25 = arith.constant 0 : index
    %c7 = arith.constant 7 : index
    %94 = vector.load %arg2[%c0_25, %c7] : memref<40x9xf32, #tpu.memory_space<vmem>>, vector<40x1xf32>
    %95 = vector.broadcast %94 : vector<40x1xf32> to vector<40x256xf32>
    %96 = arith.mulf %93, %95 : vector<40x256xf32>
    %97 = arith.addf %88, %96 : vector<40x256xf32>
    %c239_i32 = arith.constant 239 : i32
    %98 = tpu.dynamic_rotate %3 by %c239_i32 dim 1 : vector<40x256xf32>, i32 -> vector<40x256xf32>
    %99 = arith.andi %24, %28 : vector<1x256xi1>
    %cst_26 = arith.constant 0.000000e+00 : f32
    %100 = vector.shape_cast %99 : vector<1x256xi1> to vector<1x256xi1>
    %101 = vector.broadcast %100 : vector<1x256xi1> to vector<40x256xi1>
    %102 = vector.broadcast %cst_26 : f32 to vector<40x256xf32>
    %103 = arith.select %101, %98, %102 : vector<40x256xi1>, vector<40x256xf32>
    %c0_27 = arith.constant 0 : index
    %c8 = arith.constant 8 : index
    %104 = vector.load %arg2[%c0_27, %c8] : memref<40x9xf32, #tpu.memory_space<vmem>>, vector<40x1xf32>
    %105 = vector.broadcast %104 : vector<40x1xf32> to vector<40x256xf32>
    %106 = arith.mulf %103, %105 : vector<40x256xf32>
    %107 = arith.addf %97, %106 : vector<40x256xf32>
    %c0_28 = arith.constant 0 : index
    %c0_29 = arith.constant 0 : index
    %108 = vector.load %arg3[%c0_28, %c0_29] : memref<40x1xf32, #tpu.memory_space<vmem>>, vector<40x1xf32>
    %109 = vector.broadcast %108 : vector<40x1xf32> to vector<40x256xf32>
    %110 = arith.addf %107, %109 : vector<40x256xf32>
    %cst_30 = arith.constant 0.000000e+00 : f32
    %111 = vector.broadcast %cst_30 : f32 to vector<40x256xf32>
    %112 = arith.maximumf %110, %111 : vector<40x256xf32>
    %c0_31 = arith.constant 0 : index
    %c0_32 = arith.constant 0 : index
    %113 = vector.load %arg4[%c0_31, %c0_32] : memref<128x40xf32, #tpu.memory_space<vmem>>, vector<128x40xf32>
    %cst_33 = arith.constant dense<0.000000e+00> : vector<128x256xf32>
    %114 = tpu.matmul %113, %112, %cst_33 {dimension_numbers = #tpu.dot_dimension_numbers<[1], [0], [0], [1], [0, 0, 1, 1], [], []>} : vector<128x40xf32>, vector<40x256xf32>, vector<128x256xf32> -> vector<128x256xf32>
    %c0_34 = arith.constant 0 : index
    %c0_35 = arith.constant 0 : index
    %115 = vector.load %arg5[%c0_34, %c0_35] : memref<128x1xf32, #tpu.memory_space<vmem>>, vector<128x1xf32>
    %116 = vector.broadcast %115 : vector<128x1xf32> to vector<128x256xf32>
    %117 = arith.addf %114, %116 : vector<128x256xf32>
    %c0_36 = arith.constant 0 : index
    %c0_37 = arith.constant 0 : index
    %c0_38 = arith.constant 0 : index
    %118 = vector.load %arg6[%c0_36, %c0_37, %c0_38] : memref<1x128x256xf32, #tpu.memory_space<vmem>>, vector<1x128x256xf32>
    %119 = vector.shape_cast %118 : vector<1x128x256xf32> to vector<128x256xf32>
    %120 = vector.shape_cast %117 : vector<128x256xf32> to vector<1x128x256xf32>
    tpu.vector_store %arg6[%c0_36, %c0_37, %c0_38], %120 {strides = array<i32>} : memref<1x128x256xf32, #tpu.memory_space<vmem>>, vector<1x128x256xf32>,
    return
  }
  func.func @transform_0(%arg0: i32) -> (i32, i32, i32) {
    %c0_i32 = arith.constant 0 : i32
    %c0_i32_0 = arith.constant 0 : i32
    %c0_i32_1 = arith.constant 0 : i32
    return %arg0, %c0_i32, %c0_i32_0 : i32, i32, i32
  }
  func.func @transform_1(%arg0: i32) -> (i32, i32) {
    %c0_i32 = arith.constant 0 : i32
    %c0_i32_0 = arith.constant 0 : i32
    %c0_i32_1 = arith.constant 0 : i32
    return %c0_i32, %c0_i32_0 : i32, i32
  }
  func.func @transform_2(%arg0: i32) -> (i32, i32) {
    %c0_i32 = arith.constant 0 : i32
    %c0_i32_0 = arith.constant 0 : i32
    %c0_i32_1 = arith.constant 0 : i32
    return %c0_i32, %c0_i32_0 : i32, i32
  }
  func.func @transform_3(%arg0: i32) -> (i32, i32) {
    %c0_i32 = arith.constant 0 : i32
    %c0_i32_0 = arith.constant 0 : i32
    %c0_i32_1 = arith.constant 0 : i32
    return %c0_i32, %c0_i32_0 : i32, i32
  }
  func.func @transform_4(%arg0: i32) -> (i32, i32) {
    %c0_i32 = arith.constant 0 : i32
    %c0_i32_0 = arith.constant 0 : i32
    %c0_i32_1 = arith.constant 0 : i32
    return %c0_i32, %c0_i32_0 : i32, i32
  }
  func.func @transform_5(%arg0: i32) -> (i32, i32, i32) {
    %c0_i32 = arith.constant 0 : i32
    %c0_i32_0 = arith.constant 0 : i32
    %c0_i32_1 = arith.constant 0 : i32
    return %arg0, %c0_i32, %c0_i32_0 : i32, i32, i32
  }
}

</mosaic_0001>

<bundles_post_ra>
// kernel: tpu_custom_call.1
= control target key start
LH: loop header
LB: loop body
LE: loop exit
PB: predicated region body
PF: predicated region fallthrough
CT: control target
= control target key end

     0   :  { %10 = vsyncpa [#allocation3], 0  ;;  %s3071_s0 = inlined_call_operand.vmem [shape: f32[2,40,256], index: 0, kind: input, shape index: {}]   ;;  %s3072_s1 = inlined_call_operand.vmem [shape: f32[40,9], index: 1, kind: input, shape index: {}]   ;;  %s3073_s2 = inlined_call_operand.vmem [shape: f32[40,1], index: 2, kind: input, shape index: {}]   ;;  %s3074_s3 = inlined_call_operand.vmem [shape: f32[128,40], index: 3, kind: input, shape index: {}]   ;;  %s3075_s4 = inlined_call_operand.vmem [shape: f32[128,1], index: 4, kind: input, shape index: {}]   ;;  %s3076_s5 = inlined_call_operand.hbm [shape: f32[2,128,256], index: 5, kind: output, shape index: {}]  }
   0x1   :  { %12 = vsyncpa [#allocation3 + $0x1], 0  ;;  %s1731_s18 = smov 0   ;;  %s1733_s19 = smov 0  }
   0x2   :  { %s1735_s20 = smov 0   ;;  %s1737_s21 = smov 0  }
   0x3 LB: > { %s1752_s22 = sadd.s32 4294967295, %s1679_s21   ;;  %s1486_s23 = sadd.s32 4294967294, %s1679_s21   ;;  %s1679_s21 = sphi %s1737_s21, %s3186_s21   ;;  %s1675_s20 = sphi %s1735_s20, %s3185_s20   ;;  %s1671_s19 = sphi %s1733_s19, %s3184_s19   ;;  %s1667_s18 = sphi %s1731_s18, %s3183_s18  }
   0x4   : > { %s1756_s24 = sadd.s32 1, %s1679_s21   ;;  %s135_s25 = sadd.s32 1, %s1675_s20 }
   0x5   : > { %s132_s26 = ssub.s32 %s1679_s21, %s1756_s24  ;;  %p145_p0 = scmp.ne.s32.totalorder %s1675_s20, %s1671_s19 }
   0x6   : > { %p133_p1 = scmp.eq.s32.totalorder %s132_s26, 0  ;;  %p146_p2 = scmp.eq.s32.totalorder %s1752_s22, 1 }
   0x7   : > { %p151_p3 = scmp.ne.s32.totalorder %s1671_s19, %s1667_s18  ;;  %p152_p4 = scmp.eq.s32.totalorder %s1486_s23, 1 }
   0x8   : > { %s1767_s27 = scalar_select %p133_p1, %s1675_s20, %s135_s25  }
   0x9   : > { %p1769_p5 = por %p146_p2, %p145_p0  ;;  %p1773_p6 = por %p152_p4, %p151_p3 }
   0xa   : > { %p1489_p7 = scmp.ge.s32.totalorder %s1679_s21, 1  ;;  %p190_p8 = scmp.lt.s32.totalorder %s1679_s21, 3 }
   0xc   : > { %p191_p9 = pnand %p1489_p7, %p190_p8 }
   0xe   : > { %194 = sbr.rel (%p191_p9) target bundleno = 719 (0x2cf), region = 40 }
  0x15   : > { %v1782_v0 = vld [vmem:[%s3072_s1 + $0x10] sm:$0xff]  ;;  %v1787_v1 = vld [vmem:[%s3072_s1] sm:$0xff]  ;;  %p218_p10 = scmp.lt.s32.totalorder %s1752_s22, 1  ;;  %v1681_v2 = vmov 4   ;;  %v1796_v3 = vld [vmem:[%s3072_s1 + $0x18] sm:$0xff]  ;;  %s1682_s26 = smov 17  }
  0x16   : > { %1588 = vset.pattern.permute.xlu1 %v1681_v2  ;;  %1587 = vset.pattern.permute.xlu0 %v1681_v2  ;;  %v1801_v4 = vld [vmem:[%s3072_s1 + $0x8] sm:$0xff]  ;;  %v1808_v5 = vld [vmem:[%s3072_s1 + $0x20] sm:$0xff]  ;;  %v3080_v14 = vmov 0   ;;  %v1684_v19 = vmov 2   ;;  %s1685_s30 = smov 16   ;;  %v1686_v28 = vmov 1  }
  0x17   : > { %295 = vperm.xlu1 %1588, %v1782_v0   ;;  %285 = vperm.xlu0 %1587, %v1787_v1   ;;  %s219_s9 = scalar_select %p218_p10, %s1752_s22, 1  ;;  %v1689_v29 = vmov 3   ;;  %v3077_v30 = vmov 6   ;;  %v1691_v31 = vmov 5   ;;  %v1694_v36 = vmov 7   ;;  %v1006_v49 = vld [vmem:[%s3073_s2] sm:$0xff] }
  0x18   : > { %s1687_s6 = smov 15   ;;  %s1688_s7 = smov 1   ;;  %v1696_v54 = vmov 8  }
  0x19   : > { %s1528_s14 = smul.u32 80, %s219_s9  ;;  %s1692_s8 = smov 127  }
  0x1a   : > { %s1693_s9 = smov 113   ;;  %s1695_s10 = smov 112  }
  0x1b   : > { %300 = vperm.xlu1 %1588, %v1796_v3   ;;  %290 = vperm.xlu0 %1587, %v1801_v4   ;;  %s1813_s25 = scalar_lea.vmem %s3071_s0, %s1528_s14  ;;  %s1697_s13 = smov 111  }
  0x1c   : > { %v223_v6 = vld [vmem:[%s1813_s25] sm:$0xff]  ;;  %v225_v7 = vld [vmem:[%s1813_s25 + $0x10] sm:$0xff]  ;;  %v224_v17 = vld [vmem:[%s1813_s25 + $0x8] sm:$0xff]  ;;  %s1699_s14 = smov [#allocation2]  }
  0x1d   : > { %v227_v8 = vld [vmem:[%s1813_s25 + $0x20] sm:$0xff]  ;;  %v1818_v9 = vmax.f32 %v223_v6, 0.0  ;;  %v1822_v10 = vmax.f32 %v225_v7, 0.0  ;;  %v229_v12 = vld [vmem:[%s1813_s25 + $0x30] sm:$0xff]  ;;  %v226_v18 = vld [vmem:[%s1813_s25 + $0x18] sm:$0xff]  ;;  %v1840_v20 = vmax.f32 %v224_v17, 0.0  ;;  %v243_v6 = vlaneseq }
  0x1e   : > { %v1824_v11 = vmax.f32 %v227_v8, 0.0  ;;  %v231_v13 = vld [vmem:[%s1813_s25 + $0x40] sm:$0xff]  ;;  %v1831_v15 = vmax.f32 %v229_v12, 0.0  ;;  %v1842_v21 = vmax.f32 %v226_v18, 0.0  ;;  %v228_v22 = vld [vmem:[%s1813_s25 + $0x28] sm:$0xff]  ;;  %v230_v23 = vld [vmem:[%s1813_s25 + $0x38] sm:$0xff] }
  0x1f   : > { %305 = vperm.xlu0 %1587, %v1808_v5   ;;  %318 = vrot.lane.b32.xlu1 %v1818_v9, %s1682_s26  ;;  %3109 = vst [vmem:[#allocation5_spill] sm:$0xff] %v1822_v10  ;;  %v1833_v16 = vmax.f32 %v231_v13, 0.0  ;;  %v1848_v24 = vmax.f32 %v228_v22, 0.0  ;;  %v1850_v25 = vmax.f32 %v230_v23, 0.0  ;;  %v232_v26 = vld [vmem:[%s1813_s25 + $0x48] sm:$0xff]  ;;  %v2053_v8 = vand.u32 127, %v243_v6 }
  0x20   : > { %1589 = vset.pattern.permute.xlu1 %v3080_v14  ;;  %3110 = vst [vmem:[#allocation6_spill] sm:$0xff] %v1842_v21  ;;  %v1855_v27 = vmax.f32 %v232_v26, 0.0  ;;  %s1513_s25 = sshll.u32 %s1752_s22, 12  ;;  %s1621_s15 = sshll.u32 %s1699_s14, 4  ;;  %s1622_s15 = int_to_ptr.vmem [resolvable:$false] %s1621_s15 }
  0x21   : > { %vm510_vm0 = vcmp.lt.s32.totalorder %v2053_v8, 15  ;;  %vm682_vm1 = vcmp.lt.s32.totalorder %v2053_v8, 127  ;;  %vm338_vm2 = vcmp.lt.s32.totalorder %v2053_v8, 17  ;;  %vm270_vm3 = vcmp.ge.s32.totalorder %v2053_v8, 16  ;;  %s1623_s16 = scalar_lea.vmem %s1622_s15, 8192 }
  0x22   : > { %vm425_vm5 = vcmp.lt.s32.totalorder %v2053_v8, 16  ;;  %vm597_vm11 = vcmp.lt.s32.totalorder %v2053_v8, 1  ;;  %vm767_vm12 = vcmp.lt.s32.totalorder %v2053_v8, 113  ;;  %vm854_vm15 = vcmp.lt.s32.totalorder %v2053_v8, 112 }
  0x23   : > { %320 = vrot.lane.b32.xlu0 %v1822_v10, %s1682_s26  ;;  %322 = vrot.lane.b32.xlu1 %v1824_v11, %s1682_s26 }
  0x24   : > { %1595 = vset.pattern.permute.xlu0 %v1684_v19 }
  0x27   : > { %324 = vrot.lane.b32.xlu0 %v1831_v15, %s1682_s26  ;;  %326 = vrot.lane.b32.xlu1 %v1833_v16, %s1682_s26 }
  0x2b   : > { %328 = vrot.lane.b32.xlu0 %v1840_v20, %s1682_s26  ;;  %330 = vrot.lane.b32.xlu1 %v1842_v21, %s1682_s26 }
  0x2f   : > { %332 = vrot.lane.b32.xlu0 %v1848_v24, %s1682_s26  ;;  %334 = vrot.lane.b32.xlu1 %v1850_v25, %s1682_s26 }
  0x33   : > { %336 = vrot.lane.b32.xlu0 %v1855_v27, %s1682_s26  ;;  %366 = vperm.xlu1 %1589, %v1787_v1  }
  0x37   : > { %407 = vrot.lane.b32.xlu0 %v1822_v10, %s1685_s30  ;;  %374 = vperm.xlu1 %1589, %v1782_v0  }
  0x3b   : > { %411 = vrot.lane.b32.xlu0 %v1831_v15, %s1685_s30  ;;  %378 = vperm.xlu1 %1589, %v1796_v3  }
  0x3f   : > { %415 = vrot.lane.b32.xlu0 %v1840_v20, %s1685_s30  ;;  %405 = vrot.lane.b32.xlu1 %v1818_v9, %s1685_s30 }
  0x40   : > { %1590 = vset.pattern.permute.xlu1 %v1686_v28 }
  0x43   : > { %419 = vrot.lane.b32.xlu0 %v1848_v24, %s1685_s30  ;;  %409 = vrot.lane.b32.xlu1 %v1824_v11, %s1685_s30 }
  0x47   : > { %423 = vrot.lane.b32.xlu0 %v1855_v27, %s1685_s30  ;;  %413 = vrot.lane.b32.xlu1 %v1833_v16, %s1685_s30 }
  0x4b   : > { %550 = vperm.xlu0 %1595, %v1796_v3   ;;  %417 = vrot.lane.b32.xlu1 %v1842_v21, %s1685_s30 }
  0x4f   : > { %1596 = vset.pattern.permute.xlu0 %v1686_v28  ;;  %421 = vrot.lane.b32.xlu1 %v1850_v25, %s1685_s30 }
  0x50   : > { %455 = vperm.xlu0 %1596, %v1801_v4  }
  0x53   : > { %451 = vperm.xlu1 %1590, %v1787_v1  }
  0x54   : > { %459 = vperm.xlu0 %1596, %v1782_v0  }
  0x57   : > { %1591 = vset.pattern.permute.xlu1 %v1684_v19 }
  0x58   : > { %490 = vrot.lane.b32.xlu0 %v1818_v9, %s1687_s6  ;;  %538 = vperm.xlu1 %1591, %v1787_v1  }
  0x5c   : > { %500 = vrot.lane.b32.xlu0 %v1840_v20, %s1687_s6  ;;  %542 = vperm.xlu1 %1591, %v1801_v4  }
  0x60   : > { %587 = vrot.lane.b32.xlu0 %v1840_v20, %s1688_s7  ;;  %1592 = vset.pattern.permute.xlu1 %v1686_v28 }
  0x61   : > { %463 = vperm.xlu1 %1592, %v1796_v3  }
  0x64   : > { %467 = vperm.xlu0 %1596, %v1808_v5  }
  0x65   : > { %1593 = vset.pattern.permute.xlu1 %v1689_v29 }
  0x66   : > { %627 = vperm.xlu1 %1593, %v1801_v4  }
  0x68   : > { %1600 = vset.pattern.permute.xlu0 %v3077_v30 }
  0x69   : > { %799 = vperm.xlu0 %1600, %v1801_v4  }
  0x6a   : > { %1594 = vset.pattern.permute.xlu1 %v1684_v19 }
  0x6b   : > { %546 = vperm.xlu1 %1594, %v1782_v0  }
  0x6d   : > { %496 = vrot.lane.b32.xlu0 %v1831_v15, %s1687_s6 }
  0x6f   : > { %1597 = vset.pattern.permute.xlu1 %v1691_v31 }
  0x70   : > { %708 = vperm.xlu1 %1597, %v1787_v1  }
  0x71   : > { %506 = vrot.lane.b32.xlu0 %v1850_v25, %s1687_s6 }
  0x74   : > { %712 = vperm.xlu1 %1597, %v1801_v4  }
  0x75   : > { %664 = vrot.lane.b32.xlu0 %v1822_v10, %s1692_s8 }
  0x78   : > { %492 = vrot.lane.b32.xlu1 %v1822_v10, %s1687_s6 }
  0x79   : > { %674 = vrot.lane.b32.xlu0 %v1842_v21, %s1692_s8  ;;  %1598 = vset.pattern.permute.xlu1 %v1689_v29 }
  0x7c   : > { %502 = vrot.lane.b32.xlu1 %v1842_v21, %s1687_s6 }
  0x7d   : > { %803 = vperm.xlu0 %1600, %v1782_v0  }
  0x80   : > { %635 = vperm.xlu1 %1598, %v1796_v3  }
  0x81   : > { %1604 = vset.pattern.permute.xlu0 %v1689_v29 }
  0x82   : > { %623 = vperm.xlu0 %1604, %v1787_v1  }
  0x84   : > { %1599 = vset.pattern.permute.xlu1 %v3077_v30 }
  0x85   : > { %795 = vperm.xlu1 %1599, %v1787_v1  }
  0x86   : > { %631 = vperm.xlu0 %1604, %v1782_v0  }
  0x89   : > { %577 = vrot.lane.b32.xlu1 %v1818_v9, %s1688_s7 }
  0x8a   : > { %591 = vrot.lane.b32.xlu0 %v1848_v24, %s1688_s7  ;;  %1601 = vset.pattern.permute.xlu1 %v1691_v31 }
  0x8d   : > { %579 = vrot.lane.b32.xlu1 %v1822_v10, %s1688_s7 }
  0x8e   : > { %747 = vrot.lane.b32.xlu0 %v1818_v9, %s1693_s9 }
  0x91   : > { %589 = vrot.lane.b32.xlu1 %v1842_v21, %s1688_s7 }
  0x92   : > { %757 = vrot.lane.b32.xlu0 %v1840_v20, %s1693_s9 }
  0x95   : > { %716 = vperm.xlu1 %1601, %v1782_v0  }
  0x96   : > { %v1934_v32 = vpop.permute.xlu1 %295  ;;  %v1936_v33 = vpop.permute.xlu0 %285  ;;  %639 = vperm.xlu0 %1604, %v1808_v5  }
  0x99   : > { %720 = vperm.xlu1 %1601, %v1796_v3  }
  0x9a   : > { %v1940_v34 = vpop.permute.xlu1 %300  ;;  %v1942_v35 = vpop.permute.xlu0 %290  ;;  %666 = vrot.lane.b32.xlu0 %v1824_v11, %s1692_s8 }
  0x9b   : > { %3111 = vst [vmem:[#allocation7_spill] sm:$0xff] %v1942_v35  ;;  %1608 = vset.pattern.permute.xlu0 %v1691_v31 }
  0x9d   : > { %1602 = vset.pattern.permute.xlu1 %v1694_v36 }
  0x9e   : > { %v1946_v37 = vpop.permute.xlu0 %305  ;;  %676 = vrot.lane.b32.xlu0 %v1848_v24, %s1692_s8  ;;  %884 = vperm.xlu1 %1602, %v1801_v4   ;;  %v1951_v38 = vpop.permute.xlu1 %318 }
  0xa2   : > { %v1953_v39 = vpop.permute.xlu0 %320  ;;  %834 = vrot.lane.b32.xlu0 %v1818_v9, %s1695_s10  ;;  %494 = vrot.lane.b32.xlu1 %v1824_v11, %s1687_s6  ;;  %v1959_v40 = vpop.permute.xlu1 %322 }
  0xa3   : > { %3112 = vst [vmem:[#allocation8_spill] sm:$0xff] %v1953_v39  ;;  %1603 = vset.pattern.permute.xlu1 %v1684_v19 }
  0xa6   : > { %v1962_v41 = vpop.permute.xlu0 %324  ;;  %844 = vrot.lane.b32.xlu0 %v1840_v20, %s1695_s10  ;;  %504 = vrot.lane.b32.xlu1 %v1848_v24, %s1687_s6  ;;  %v1968_v42 = vpop.permute.xlu1 %326 }
  0xaa   : > { %v1970_v43 = vpop.permute.xlu0 %328  ;;  %724 = vperm.xlu0 %1608, %v1808_v5   ;;  %662 = vrot.lane.b32.xlu1 %v1818_v9, %s1692_s8  ;;  %v1975_v44 = vpop.permute.xlu1 %330 }
  0xab   : > { %3113 = vst [vmem:[#allocation9_spill] sm:$0xff] %v1975_v44  ;;  %v309_v44 = vmul.f32 %v1936_v33, %v1840_v20 }
  0xae   : > { %v1977_v45 = vpop.permute.xlu0 %332  ;;  %1609 = vset.pattern.permute.xlu0 %v3080_v14  ;;  %672 = vrot.lane.b32.xlu1 %v1840_v20, %s1692_s8  ;;  %v1982_v46 = vpop.permute.xlu1 %334 }
  0xaf   : > { %370 = vperm.xlu0 %1609, %v1801_v4  }
  0xb2   : > { %v1985_v47 = vpop.permute.xlu0 %336  ;;  %554 = vperm.xlu1 %1603, %v1808_v5   ;;  %v1988_v48 = vpop.permute.xlu1 %366 }
  0xb3   : > { %382 = vperm.xlu0 %1609, %v1808_v5  }
  0xb6   : > { %v1994_v50 = vpop.permute.xlu0 %407  ;;  %1605 = vset.pattern.permute.xlu1 %v3077_v30  ;;  %v1997_v51 = vpop.permute.xlu1 %374 }
  0xb7   : > { %3114 = vst [vmem:[#allocation10_spill] sm:$0xff] %v1994_v50  ;;  %1013 = vperm.xlu0 %1609, %v1006_v49   ;;  %807 = vperm.xlu1 %1605, %v1796_v3  }
  0xba   : > { %v2000_v52 = vpop.permute.xlu0 %411  ;;  %v2002_v53 = vpop.permute.xlu1 %378 }
  0xbb   : > { %1611 = vset.pattern.permute.xlu0 %v1694_v36  ;;  %1606 = vset.pattern.permute.xlu1 %v1696_v54 }
  0xbc   : > { %880 = vperm.xlu0 %1611, %v1787_v1   ;;  %967 = vperm.xlu1 %1606, %v1787_v1  }
  0xbe   : > { %v2006_v55 = vpop.permute.xlu0 %415  ;;  %v2008_v56 = vpop.permute.xlu1 %405 }
  0xc0   : > { %508 = vrot.lane.b32.xlu0 %v1855_v27, %s1687_s6  ;;  %581 = vrot.lane.b32.xlu1 %v1824_v11, %s1688_s7 }
  0xc1   : > { %1607 = vset.pattern.permute.xlu1 %v1694_v36 }
  0xc2   : > { %v2014_v57 = vpop.permute.xlu0 %419  ;;  %v2016_v58 = vpop.permute.xlu1 %409 }
  0xc4   : > { %753 = vrot.lane.b32.xlu0 %v1831_v15, %s1693_s9  ;;  %583 = vrot.lane.b32.xlu1 %v1831_v15, %s1688_s7 }
  0xc6   : > { %v2022_v59 = vpop.permute.xlu0 %423  ;;  %v2024_v60 = vpop.permute.xlu1 %413 }
  0xc8   : > { %763 = vrot.lane.b32.xlu0 %v1850_v25, %s1693_s9  ;;  %593 = vrot.lane.b32.xlu1 %v1850_v25, %s1688_s7 }
  0xca   : > { %v2030_v61 = vpop.permute.xlu1 %417  ;;  %v2032_v62 = vpop.permute.xlu0 %550 }
  0xcb   : > { %3115 = vst [vmem:[#allocation11_spill] sm:$0xff] %v2030_v61  ;;  %3116 = vst [vmem:[#allocation12_spill] sm:$0xff] %v2032_v62 }
  0xcc   : > { %921 = vrot.lane.b32.xlu0 %v1822_v10, %s1697_s13  ;;  %749 = vrot.lane.b32.xlu1 %v1822_v10, %s1693_s9 }
  0xce   : > { %v2038_v63 = vpop.permute.xlu1 %421 }
  0xcf   : > { %v2040_v1 = vpop.permute.xlu0 %455 }
  0xd0   : > { %3117 = vst [vmem:[#allocation13_spill] sm:$0xff] %v2040_v1  ;;  %931 = vrot.lane.b32.xlu0 %v1842_v21, %s1697_s13  ;;  %759 = vrot.lane.b32.xlu1 %v1842_v21, %s1693_s9 }
  0xd2   : > { %v2046_v2 = vpop.permute.xlu1 %451 }
  0xd3   : > { %v2048_v7 = vpop.permute.xlu0 %459 }
  0xd4   : > { %585 = vrot.lane.b32.xlu0 %v1833_v16, %s1688_s7  ;;  %888 = vperm.xlu1 %1607, %v1782_v0  }
  0xd7   : > { %v491_v12 = vpop.permute.xlu0 %490  ;;  %v2055_v13 = vpop.permute.xlu1 %538 }
  0xd8   : > { %838 = vrot.lane.b32.xlu0 %v1824_v11, %s1695_s10  ;;  %892 = vperm.xlu1 %1607, %v1796_v3  }
  0xdb   : > { %v501_v17 = vpop.permute.xlu0 %500  ;;  %v2061_v18 = vpop.permute.xlu1 %542 }
  0xdc   : > { %3118 = vst [vmem:[#allocation14_spill] sm:$0xff] %v2061_v18  ;;  %v2065_v19 = vsel %vm510_vm0, %v491_v12, %v501_v17  ;;  %v2069_v22 = vsel %vm510_vm0, %v501_v17, %v491_v12  ;;  %848 = vrot.lane.b32.xlu0 %v1848_v24, %s1695_s10  ;;  %668 = vrot.lane.b32.xlu1 %v1831_v15, %s1692_s8  ;;  %v1010_v18 = vld [vmem:[%s3073_s2 + $0x20] sm:$0xff] }
  0xdd   : > { %1610 = vset.pattern.permute.xlu1 %v1696_v54 }
  0xdf   : > { %v2075_v23 = vpop.permute.xlu0 %587 }
  0xe0   : > { %896 = vperm.xlu0 %1611, %v1808_v5   ;;  %678 = vrot.lane.b32.xlu1 %v1850_v25, %s1692_s8  ;;  %v2080_v26 = vpop.permute.xlu1 %463 }
  0xe3   : > { %v2082_v28 = vpop.permute.xlu0 %467 }
  0xe4   : > { %1614 = vset.pattern.permute.xlu0 %v1696_v54  ;;  %836 = vrot.lane.b32.xlu1 %v1822_v10, %s1695_s10  ;;  %v1074_v10 = vld [vmem:[%s3075_s4 + $0x10] sm:$0xff] }
  0xe5   : > { %971 = vperm.xlu0 %1614, %v1801_v4   ;;  %v2087_v29 = vpop.permute.xlu1 %627 }
  0xe6   : > { %3119 = vst [vmem:[#allocation15_spill] sm:$0xff] %v2087_v29 }
  0xe8   : > { %v2089_v31 = vpop.permute.xlu0 %799  ;;  %846 = vrot.lane.b32.xlu1 %v1842_v21, %s1695_s10 }
  0xe9   : > { %3120 = vst [vmem:[#allocation16_spill] sm:$0xff] %v2089_v31  ;;  %670 = vrot.lane.b32.xlu0 %v1833_v16, %s1692_s8 }
  0xea   : > { %v2095_v36 = vpop.permute.xlu1 %546 }
  0xec   : > { %v497_v49 = vpop.permute.xlu0 %496  ;;  %975 = vperm.xlu1 %1610, %v1782_v0   ;;  %v1007_v0 = vld [vmem:[%s3073_s2 + $0x8] sm:$0xff] }
  0xed   : > { %923 = vrot.lane.b32.xlu0 %v1824_v11, %s1697_s13 }
  0xef   : > { %v2100_v54 = vpop.permute.xlu1 %708 }
  0xf0   : > { %v507_v4 = vpop.permute.xlu0 %506  ;;  %979 = vperm.xlu1 %1610, %v1796_v3   ;;  %v2122_v3 = vadd.s32 128, %v2053_v8 }
  0xf1   : > { %v2105_v6 = vsel %vm510_vm0, %v497_v49, %v507_v4  ;;  %v2109_v12 = vsel %vm510_vm0, %v507_v4, %v497_v49  ;;  %933 = vrot.lane.b32.xlu0 %v1848_v24, %s1697_s13  ;;  %v250_v49 = vand.u32 15, %v2053_v8 }
  0xf2   : > { %3122 = vst [vmem:[#allocation18_spill] sm:$0xff] %v2122_v3  ;;  %vm273_vm13 = vcmp.lt.s32.totalorder %v2122_v3, 240 }
  0xf3   : > { %v2116_v17 = vpop.permute.xlu1 %712  ;;  %vm2147_vm4 = vcmp.ge.s32.totalorder %v250_v49, 1  ;;  %vm2170_vm7 = vcmp.le.s32.totalorder %v250_v49, 14  ;;  %v431_v49 = vsel %vm425_vm5, %v2006_v55, %v2008_v56 }
  0xf4   : > { %3121 = vst [vmem:[#allocation17_spill] sm:$0xff] %v2116_v17  ;;  %v665_v30 = vpop.permute.xlu0 %664  ;;  %1612 = vset.pattern.permute.xlu1 %v3080_v14  ;;  %v3127_v17 = vmov 0   ;;  %vm2166_vm6 = vmand %vm270_vm3, %vm2147_vm4 }
  0xf5   : > { %1018 = vperm.xlu1 %1612, %v1007_v0   ;;  %983 = vperm.xlu0 %1614, %v1808_v5   ;;  %v3126_v0 = vmov 6   ;;  %vm2201_vm10 = vmand %vm270_vm3, %vm2170_vm7 }
  0xf7   : > { %v2125_v4 = vpop.permute.xlu1 %492 }
  0xf8   : > { %3123 = vst [vmem:[#allocation19_spill] sm:$0xff] %v2125_v4  ;;  %v675_v31 = vpop.permute.xlu0 %674 }
  0xf9   : > { %v2129_v29 = vsel %vm682_vm1, %v665_v30, %v675_v31  ;;  %v2133_v14 = vsel %vm682_vm1, %v675_v31, %v665_v30  ;;  %498 = vrot.lane.b32.xlu1 %v1833_v16, %s1687_s6  ;;  %842 = vrot.lane.b32.xlu0 %v1833_v16, %s1695_s10  ;;  %s3018_s6 = scalar_lea.hbm %s3076_s5, %s1513_s25 }
  0xfa   : > { %3124 = vst [vmem:[#allocation20_spill] sm:$0xff] %v2129_v29  ;;  %3125 = vst [vmem:[#allocation21_spill] sm:$0xff] %v2133_v14  ;;  %1613 = vset.pattern.permute.xlu1 %v3126_v0  ;;  %1616 = vset.pattern.permute.xlu0 %v3127_v17  ;;  %v257_v29 = vand.u32 15, %v2122_v3  ;;  %v344_v0 = vsel %vm338_vm2, %v1970_v43, %v1951_v38 }
  0xfb   : > { %v2151_v31 = vpop.permute.xlu1 %502  ;;  %v355_v61 = vsel %vm2166_vm6, %v344_v0, 0.0  ;;  %v308_v0 = vmul.f32 %v1936_v33, %v1818_v9 }
  0xfc   : > { %3130 = vst [vmem:[#allocation22_spill] sm:$0xff] %v2151_v31  ;;  %v2153_v14 = vpop.permute.xlu0 %803  ;;  %v339_v31 = vsel %vm338_vm2, %v1951_v38, %v1970_v43  ;;  %vm2181_vm8 = vcmp.ge.s32.totalorder %v257_v29, 1  ;;  %vm2193_vm9 = vcmp.le.s32.totalorder %v257_v29, 14  ;;  %v385_v35 = vmul.f32 %v1988_v48, %v355_v61 }
  0xfd   : > { %3131 = vst [vmem:[#allocation23_spill] sm:$0xff] %v2153_v14  ;;  %751 = vrot.lane.b32.xlu1 %v1824_v11, %s1693_s9  ;;  %1033 = vperm.xlu0 %1616, %v1010_v18   ;;  %v1072_v18 = vld [vmem:[%s3075_s4] sm:$0xff]  ;;  %v356_v29 = vsel %vm2181_vm8, %v339_v31, 0.0  ;;  %v527_v61 = vsel %vm2201_vm10, %v2069_v22, 0.0  ;;  %v528_v33 = vsel %vm2193_vm9, %v2065_v19, 0.0  ;;  %vm2339_vm14 = vmand %vm273_vm13, %vm2181_vm8 }
  0xfe   : > { %v386_v39 = vmul.f32 %v1988_v48, %v356_v29  ;;  %v557_v19 = vmul.f32 %v2055_v13, %v527_v61  ;;  %v558_v29 = vmul.f32 %v2055_v13, %v528_v33  ;;  %v1078_v13 = vld [vmem:[%s3075_s4 + $0x30] sm:$0xff]  ;;  %v1064_v14 = vld [vmem:[%s3074_s3 + $0x40] sm:$0xff] }
  0xff   : > { %v2185_v21 = vpop.permute.xlu1 %635 }
 0x100   : > { %3138 = vst [vmem:[#allocation24_spill] sm:$0xff] %v2185_v21  ;;  %v426_v21 = vsel %vm425_vm5, %v2008_v56, %v2006_v55  ;;  %v395_v55 = vadd.f32 %v385_v35, %v308_v0  ;;  %v1076_v56 = vld [vmem:[%s3075_s4 + $0x20] sm:$0xff]  ;;  %v396_v22 = vadd.f32 %v386_v39, %v309_v44 }
 0x101   : > { %v624_v43 = vpop.permute.xlu0 %623  ;;  %761 = vrot.lane.b32.xlu1 %v1848_v24, %s1693_s9  ;;  %1090 = vperm.xlu0 %1616, %v1072_v18   ;;  %v440_v18 = vsel %vm270_vm3, %v431_v49, 0.0  ;;  %v471_v48 = vmul.f32 %v2046_v2, %v426_v21 }
 0x102   : > { %v470_v31 = vmul.f32 %v2046_v2, %v440_v18 }
 0x103   : > { %v481_v2 = vadd.f32 %v471_v48, %v396_v22 }
 0x104   : > { %v2231_v62 = vpop.permute.xlu1 %795  ;;  %v480_v18 = vadd.f32 %v470_v31, %v395_v55 }
 0x105   : > { %v2234_v49 = vpop.permute.xlu0 %631  ;;  %919 = vrot.lane.b32.xlu1 %v1818_v9, %s1697_s13  ;;  %1100 = vperm.xlu0 %1616, %v1074_v10   ;;  %v568_v31 = vadd.f32 %v558_v29, %v481_v2  ;;  %v1082_v29 = vld [vmem:[%s3075_s4 + $0x50] sm:$0xff]  ;;  %v1084_v2 = vld [vmem:[%s3075_s4 + $0x60] sm:$0xff] }
 0x106   : > { %v567_v0 = vadd.f32 %v557_v19, %v480_v18 }
 0x108   : > { %v578_v21 = vpop.permute.xlu1 %577 }
 0x109   : > { %v598_v9 = vsel %vm597_vm11, %v578_v21, %v2075_v23  ;;  %v603_v10 = vsel %vm597_vm11, %v2075_v23, %v578_v21  ;;  %v2250_v35 = vpop.permute.xlu0 %591  ;;  %929 = vrot.lane.b32.xlu1 %v1840_v20, %s1697_s13  ;;  %1110 = vperm.xlu0 %1616, %v1076_v56   ;;  %v1080_v56 = vld [vmem:[%s3075_s4 + $0x40] sm:$0xff] }
 0x10a   : > { %v612_v39 = vsel %vm2147_vm4, %v603_v10, 0.0  ;;  %v613_v44 = vsel %vm2181_vm8, %v598_v9, 0.0 }
 0x10b   : > { %v642_v61 = vmul.f32 %v624_v43, %v612_v39  ;;  %v643_v23 = vmul.f32 %v624_v43, %v613_v44  ;;  %v1086_v39 = vld [vmem:[%s3075_s4 + $0x70] sm:$0xff] }
 0x10c   : > { %v2261_v33 = vpop.permute.xlu1 %579 }
 0x10d   : > { %3143 = vst [vmem:[#allocation25_spill] sm:$0xff] %v2261_v33  ;;  %v2263_v48 = vadd.f32 %v642_v61, %v567_v0  ;;  %v2265_v20 = vadd.f32 %v643_v23, %v568_v31  ;;  %v748_v55 = vpop.permute.xlu0 %747  ;;  %811 = vperm.xlu1 %1613, %v1808_v5   ;;  %1120 = vperm.xlu0 %1616, %v1078_v13   ;;  %v1009_v61 = vld [vmem:[%s3073_s2 + $0x18] sm:$0xff] }
 0x110   : > { %v2272_v22 = vpop.permute.xlu1 %589 }
 0x111   : > { %3144 = vst [vmem:[#allocation26_spill] sm:$0xff] %v2272_v22  ;;  %v758_v19 = vpop.permute.xlu0 %757  ;;  %595 = vrot.lane.b32.xlu1 %v1855_v27, %s1688_s7  ;;  %1130 = vperm.xlu0 %1616, %v1080_v56   ;;  %v316_v22 = vmul.f32 %v1946_v37, %v1833_v16 }
 0x112   : > { %v768_v43 = vsel %vm767_vm12, %v748_v55, %v758_v19  ;;  %v773_v5 = vsel %vm767_vm12, %v758_v19, %v748_v55  ;;  %1615 = vset.pattern.permute.xlu1 %v3127_v17  ;;  %v1008_v17 = vld [vmem:[%s3073_s2 + $0x10] sm:$0xff] }
 0x113   : > { %v785_v3 = vsel %vm2339_vm14, %v773_v5, 0.0 }
 0x114   : > { %v2284_v18 = vpop.permute.xlu1 %716 }
 0x115   : > { %v2286_v21 = vpop.permute.xlu0 %639  ;;  %840 = vrot.lane.b32.xlu1 %v1831_v15, %s1695_s10  ;;  %1140 = vperm.xlu0 %1616, %v1082_v29  }
 0x116   : > { %3145 = vst [vmem:[#allocation27_spill] sm:$0xff] %v2286_v21 }
 0x118   : > { %v2293_v9 = vpop.permute.xlu1 %720 }
 0x119   : > { %v667_v10 = vpop.permute.xlu0 %666  ;;  %850 = vrot.lane.b32.xlu1 %v1850_v25, %s1695_s10  ;;  %1150 = vperm.xlu0 %1616, %v1084_v2  }
 0x11d   : > { %v677_v44 = vpop.permute.xlu0 %676  ;;  %1023 = vperm.xlu1 %1615, %v1008_v17   ;;  %v2303_v13 = vpop.permute.xlu1 %884  ;;  %1160 = vperm.xlu0 %1616, %v1086_v39  }
 0x11e   : > { %3146 = vst [vmem:[#allocation28_spill] sm:$0xff] %v2303_v13  ;;  %v2307_v0 = vsel %vm682_vm1, %v667_v10, %v677_v44  ;;  %v2311_v31 = vsel %vm682_vm1, %v677_v44, %v667_v10  ;;  %v784_v13 = vsel %vm2147_vm4, %v768_v43, 0.0 }
 0x121   : > { %1028 = vperm.xlu1 %1615, %v1009_v61   ;;  %v495_v23 = vpop.permute.xlu1 %494  ;;  %v2316_v55 = vpop.permute.xlu0 %834  ;;  %v343_v61 = vsel %vm338_vm2, %v1968_v42, %v1985_v47 }
 0x122   : > { %3147 = vst [vmem:[#allocation29_spill] sm:$0xff] %v2316_v55 }
 0x125   : > { %680 = vrot.lane.b32.xlu1 %v1855_v27, %s1692_s8  ;;  %v505_v56 = vpop.permute.xlu1 %504  ;;  %v2320_v19 = vpop.permute.xlu0 %844 }
 0x126   : > { %3148 = vst [vmem:[#allocation30_spill] sm:$0xff] %v2320_v19  ;;  %v2324_v29 = vsel %vm510_vm0, %v495_v23, %v505_v56  ;;  %v2328_v2 = vsel %vm510_vm0, %v505_v56, %v495_v23  ;;  %v348_v23 = vsel %vm338_vm2, %v1985_v47, %v1968_v42 }
 0x127   : > { %v363_v5 = vsel %vm2166_vm6, %v348_v23, 0.0 }
 0x129   : > { %925 = vrot.lane.b32.xlu1 %v1831_v15, %s1697_s13  ;;  %v663_v10 = vpop.permute.xlu1 %662  ;;  %v2333_v17 = vpop.permute.xlu0 %724 }
 0x12a   : > { %3149 = vst [vmem:[#allocation31_spill] sm:$0xff] %v2333_v17 }
 0x12d   : > { %935 = vrot.lane.b32.xlu1 %v1850_v25, %s1697_s13  ;;  %v673_v44 = vpop.permute.xlu1 %672 }
 0x12e   : > { %v683_v56 = vsel %vm682_vm1, %v663_v10, %v673_v44  ;;  %v688_v17 = vsel %vm682_vm1, %v673_v44, %v663_v10  ;;  %v2357_v21 = vpop.permute.xlu0 %370  ;;  %v435_v10 = vsel %vm425_vm5, %v2022_v59, %v2024_v60 }
 0x12f   : > { %v697_v19 = vsel %vm2170_vm7, %v683_v56, 0.0  ;;  %v698_v42 = vsel %vm2193_vm9, %v688_v17, 0.0  ;;  %v364_v17 = vsel %vm2181_vm8, %v343_v61, 0.0 }
 0x130   : > { %v727_v47 = vmul.f32 %v2100_v54, %v697_v19  ;;  %v728_v55 = vmul.f32 %v2100_v54, %v698_v42  ;;  %v814_v19 = vmul.f32 %v2231_v62, %v784_v13  ;;  %v815_v54 = vmul.f32 %v2231_v62, %v785_v3 }
 0x131   : > { %755 = vrot.lane.b32.xlu1 %v1833_v16, %s1693_s9  ;;  %v2375_v43 = vpop.permute.xlu1 %554  ;;  %v430_v13 = vsel %vm425_vm5, %v2024_v60, %v2022_v59  ;;  %v448_v62 = vsel %vm270_vm3, %v435_v10, 0.0  ;;  %v341_v59 = vsel %vm338_vm2, %v1959_v40, %v1977_v45  ;;  %v346_v60 = vsel %vm338_vm2, %v1977_v45, %v1959_v40 }
 0x132   : > { %3152 = vst [vmem:[#allocation32_spill] sm:$0xff] %v2375_v43  ;;  %v737_v44 = vadd.f32 %v727_v47, %v2263_v48  ;;  %v738_v56 = vadd.f32 %v728_v55, %v2265_v20  ;;  %v383_v42 = vpop.permute.xlu0 %382  ;;  %v317_v43 = vmul.f32 %v1946_v37, %v1855_v27  ;;  %v478_v20 = vmul.f32 %v2082_v28, %v448_v62 }
 0x133   : > { %v393_v33 = vmul.f32 %v383_v42, %v363_v5  ;;  %v394_v23 = vmul.f32 %v383_v42, %v364_v17  ;;  %v479_v55 = vmul.f32 %v2082_v28, %v430_v13  ;;  %v359_v5 = vsel %vm2166_vm6, %v346_v60, 0.0 }
 0x134   : > { %v2395_v3 = vadd.f32 %v814_v19, %v737_v44  ;;  %v2397_v48 = vadd.f32 %v815_v54, %v738_v56  ;;  %v360_v40 = vsel %vm2181_vm8, %v341_v59, 0.0  ;;  %v342_v45 = vsel %vm338_vm2, %v1962_v41, %v1982_v46 }
 0x135   : > { %v403_v61 = vadd.f32 %v393_v33, %v316_v22  ;;  %v404_v37 = vadd.f32 %v394_v23, %v317_v43  ;;  %765 = vrot.lane.b32.xlu1 %v1855_v27, %s1693_s9  ;;  %v433_v22 = vsel %vm425_vm5, %v2014_v57, %v2016_v58  ;;  %v312_v43 = vmul.f32 %v1934_v32, %v1824_v11 }
 0x136   : > { %v2411_v47 = vpop.permute.xlu1 %807  ;;  %v2413_v10 = vpop.permute.xlu0 %1013  ;;  %v347_v17 = vsel %vm338_vm2, %v1982_v46, %v1962_v41  ;;  %v389_v11 = vmul.f32 %v1997_v51, %v359_v5  ;;  %v390_v19 = vmul.f32 %v1997_v51, %v360_v40  ;;  %v428_v54 = vsel %vm425_vm5, %v2016_v58, %v2014_v57 }
 0x137   : > { %v2415_v28 = vadd.f32 %v478_v20, %v403_v61  ;;  %v2417_v33 = vadd.f32 %v479_v55, %v404_v37  ;;  %v444_v44 = vsel %vm270_vm3, %v433_v22, 0.0  ;;  %v531_v56 = vsel %vm2201_vm10, %v2328_v2, 0.0 }
 0x138   : > { %v532_v41 = vsel %vm2193_vm9, %v2324_v29, 0.0  ;;  %v313_v51 = vmul.f32 %v1934_v32, %v1848_v24  ;;  %v434_v57 = vsel %vm425_vm5, %v2038_v63, %v2000_v52  ;;  %v474_v58 = vmul.f32 %v2048_v7, %v444_v44 }
 0x139   : > { %852 = vrot.lane.b32.xlu1 %v1855_v27, %s1695_s10  ;;  %v475_v2 = vmul.f32 %v2048_v7, %v428_v54  ;;  %v314_v23 = vmul.f32 %v1940_v34, %v1831_v15  ;;  %v315_v29 = vmul.f32 %v1940_v34, %v1850_v25  ;;  %v361_v13 = vsel %vm2166_vm6, %v347_v17, 0.0 }
 0x13a   : > { %v362_v24 = vsel %vm2181_vm8, %v342_v45, 0.0  ;;  %v399_v32 = vadd.f32 %v389_v11, %v312_v43  ;;  %v400_v62 = vadd.f32 %v390_v19, %v313_v51  ;;  %v561_v20 = vmul.f32 %v2095_v36, %v531_v56 }
 0x13b   : > { %v2453_v46 = vpop.permute.xlu0 %880  ;;  %v2455_v42 = vpop.permute.xlu1 %967  ;;  %v562_v7 = vmul.f32 %v2095_v36, %v532_v41  ;;  %v391_v15 = vmul.f32 %v2002_v53, %v361_v13  ;;  %v392_v55 = vmul.f32 %v2002_v53, %v362_v24  ;;  %v429_v25 = vsel %vm425_vm5, %v2000_v52, %v2038_v63 }
 0x13c   : > { %v446_v34 = vsel %vm270_vm3, %v434_v57, 0.0  ;;  %v484_v37 = vadd.f32 %v474_v58, %v399_v32  ;;  %v485_v59 = vadd.f32 %v475_v2, %v400_v62  ;;  %v701_v52 = vsel %vm2170_vm7, %v2307_v0, 0.0  ;;  %v1073_v0 = vld [vmem:[%s3075_s4 + $0x8] sm:$0xff] }
 0x13d   : > { %927 = vrot.lane.b32.xlu1 %v1833_v16, %s1697_s13  ;;  %v702_v63 = vsel %vm2193_vm9, %v2311_v31, 0.0  ;;  %v476_v31 = vmul.f32 %v2080_v26, %v446_v34  ;;  %v477_v45 = vmul.f32 %v2080_v26, %v429_v25  ;;  %v533_v17 = vsel %vm2201_vm10, %v2109_v12, 0.0  ;;  %v3153_v26 = vld [vmem:[#allocation12_spill] sm:$0xff] }
 0x13e   : > { %v571_v43 = vadd.f32 %v561_v20, %v484_v37  ;;  %v572_v5 = vadd.f32 %v562_v7, %v485_v59  ;;  %v732_v54 = vmul.f32 %v2284_v18, %v702_v63  ;;  %v401_v41 = vadd.f32 %v391_v15, %v314_v23  ;;  %v1075_v12 = vld [vmem:[%s3075_s4 + $0x18] sm:$0xff] }
 0x13f   : > { %v2485_v61 = vpop.permute.xlu0 %508  ;;  %v582_v16 = vpop.permute.xlu1 %581  ;;  %v402_v51 = vadd.f32 %v392_v55, %v315_v29  ;;  %v563_v57 = vmul.f32 %v3153_v26, %v533_v17  ;;  %v3154_v55 = vld [vmem:[#allocation24_spill] sm:$0xff] }
 0x140   : > { %v600_v36 = vsel %vm597_vm11, %v582_v16, %v2250_v35  ;;  %v605_v53 = vsel %vm597_vm11, %v2250_v35, %v582_v16  ;;  %v1077_v16 = vld [vmem:[%s3075_s4 + $0x28] sm:$0xff]  ;;  %v1079_v63 = vld [vmem:[%s3075_s4 + $0x38] sm:$0xff] }
 0x141   : > { %v616_v60 = vsel %vm2147_vm4, %v605_v53, 0.0  ;;  %v617_v22 = vsel %vm2181_vm8, %v600_v36, 0.0  ;;  %937 = vrot.lane.b32.xlu1 %v1855_v27, %s1697_s13  ;;  %v534_v27 = vsel %vm2193_vm9, %v2105_v6, 0.0  ;;  %v487_v32 = vadd.f32 %v477_v45, %v402_v51  ;;  %v1085_v45 = vld [vmem:[%s3075_s4 + $0x68] sm:$0xff]  ;;  %s215_s13 = sand.u32 1, %s1671_s19  }
 0x142   : > { %v646_v35 = vmul.f32 %v2234_v49, %v616_v60  ;;  %v647_v40 = vmul.f32 %v2234_v49, %v617_v22  ;;  %v731_v49 = vmul.f32 %v2284_v18, %v701_v52  ;;  %v564_v58 = vmul.f32 %v3153_v26, %v534_v27  ;;  %s1490_s17 = sshll.u32 %s215_s13, 8  ;;  %s3029_s11 = scalar_lea.sflag [#allocation3], %s215_s13 }
 0x143   : > { %v754_v11 = vpop.permute.xlu0 %753  ;;  %v584_v19 = vpop.permute.xlu1 %583  ;;  %v486_v18 = vadd.f32 %v476_v31, %v401_v41  ;;  %v1698_v52 = vmov 0.0   ;;  %s2976_s23 = scalar_lea.vmem [#allocation2], %s1490_s17 }
 0x144   : > { %v656_v44 = vadd.f32 %v646_v35, %v571_v43  ;;  %v657_v56 = vadd.f32 %v647_v40, %v572_v5  ;;  %v574_v15 = vadd.f32 %v564_v58, %v487_v32  ;;  %1281 = vmatprep.mubr.f32.mxu0 %v1698_v52  ;;  %1329 = vmatprep.mubr.f32.mxu1 %v1698_v52  ;;  %v1081_v43 = vld [vmem:[%s3075_s4 + $0x48] sm:$0xff]  ;;  %v1083_v40 = vld [vmem:[%s3075_s4 + $0x58] sm:$0xff]  ;;  %s1424_s7 = sshll.u32 %s2976_s23, 4  ;;  %s3021_s7 = int_to_ptr.vmem [resolvable:$true] %s1424_s7 }
 0x145   : > { %1095 = vperm.xlu1 %1615, %v1073_v0   ;;  %v573_v7 = vadd.f32 %v563_v57, %v486_v18  ;;  %s1617_s12 = scalar_lea.vmem %s3021_s7, 4096  ;;  %p1624_p0 = scmp.lt.s32.totalorder %s3021_s7, %s1622_s15 }
 0x146   : > { %v2525_v6 = vadd.f32 %v731_v49, %v656_v44  ;;  %v2527_v2 = vadd.f32 %v732_v54, %v657_v56  ;;  %v1087_v49 = vld [vmem:[%s3075_s4 + $0x78] sm:$0xff]  ;;  %p1618_p11 = scmp.ne.s32.totalorder %s3021_s7, %s1617_s12  ;;  %p1625_p1 = scmp.lt.s32.totalorder %s1623_s16, %s1617_s12 }
 0x147   : > { %v764_v13 = vpop.permute.xlu0 %763  ;;  %v594_v24 = vpop.permute.xlu1 %593 }
 0x148   : > { %v601_v23 = vsel %vm597_vm11, %v584_v19, %v594_v24  ;;  %v606_v29 = vsel %vm597_vm11, %v594_v24, %v584_v19  ;;  %v771_v27 = vsel %vm767_vm12, %v754_v11, %v764_v13  ;;  %v776_v19 = vsel %vm767_vm12, %v764_v13, %v754_v11  ;;  %p1619_p12 = pnand %p1618_p11, %p1769_p5  ;;  %p1626_p2 = por %p1625_p1, %p1624_p0 }
 0x149   : > { %v618_v62 = vsel %vm2147_vm4, %v606_v29, 0.0  ;;  %v619_v20 = vsel %vm2181_vm8, %v601_v23, 0.0  ;;  %1105 = vperm.xlu1 %1615, %v1075_v12   ;;  %v790_v51 = vsel %vm2147_vm4, %v771_v27, 0.0  ;;  %v791_v26 = vsel %vm2339_vm14, %v776_v19, 0.0  ;;  %v3155_v29 = vld [vmem:[#allocation8_spill] sm:$0xff]  ;;  %v3161_v19 = vld [vmem:[#allocation6_spill] sm:$0xff] }
 0x14a   : > { %v648_v25 = vmul.f32 %v3154_v55, %v618_v62  ;;  %v649_v34 = vmul.f32 %v3154_v55, %v619_v20  ;;  %v820_v24 = vmul.f32 %v2411_v47, %v790_v51  ;;  %v821_v18 = vmul.f32 %v2411_v47, %v791_v26  ;;  %v3156_v62 = vld [vmem:[#allocation9_spill] sm:$0xff]  ;;  %p1620_p13 = pneg %p1619_p12 }
 0x14b   : > { %v2542_v37 = vpop.permute.xlu0 %921  ;;  %v2544_v59 = vpop.permute.xlu1 %749  ;;  %v345_v20 = vsel %vm338_vm2, %v3156_v62, %v3155_v29 }
 0x14c   : > { %v658_v36 = vadd.f32 %v648_v25, %v573_v7  ;;  %v659_v53 = vadd.f32 %v649_v34, %v574_v15  ;;  %v340_v7 = vsel %vm338_vm2, %v3155_v29, %v3156_v62  ;;  %v357_v47 = vsel %vm2166_vm6, %v345_v20, 0.0  ;;  %v3165_v29 = vld [vmem:[#allocation25_spill] sm:$0xff]  ;;  %v3166_v62 = vld [vmem:[#allocation26_spill] sm:$0xff]  ;;  %p1627_p3 = pnand %p1626_p2, %p1620_p13 }
 0x14d   : > { %1115 = vperm.xlu1 %1615, %v1077_v16   ;;  %v358_v34 = vsel %vm2181_vm8, %v340_v7, 0.0  ;;  %v387_v16 = vmul.f32 %v2357_v21, %v357_v47  ;;  %v604_v20 = vsel %vm597_vm11, %v3166_v62, %v3165_v29  ;;  %v599_v47 = vsel %vm597_vm11, %v3165_v29, %v3166_v62 }
 0x14e   : > { %vm939_vm2 = vcmp.lt.s32.totalorder %v2053_v8, 111  ;;  %v1056_v8 = vld [vmem:[%s3074_s3] sm:$0xff] }
 0x14f   : > { %v2551_v60 = vpop.permute.xlu0 %931  ;;  %v2553_v22 = vpop.permute.xlu1 %759 }
 0x151   : > { %1125 = vperm.xlu1 %1615, %v1079_v63   ;;  %v3158_v63 = vld [vmem:[#allocation7_spill] sm:$0xff] }
 0x152   : > { %v311_v1 = vmul.f32 %v3158_v63, %v3161_v19 }
 0x153   : > { %v2558_v5 = vpop.permute.xlu1 %888  ;;  %v2560_v35 = vpop.permute.xlu0 %585 }
 0x155   : > { %1135 = vperm.xlu1 %1615, %v1081_v43  }
 0x157   : > { %v2565_v0 = vpop.permute.xlu1 %892  ;;  %v2567_v31 = vpop.permute.xlu0 %838 }
 0x159   : > { %1145 = vperm.xlu1 %1615, %v1083_v40   ;;  %v3159_v40 = vld [vmem:[#allocation10_spill] sm:$0xff] }
 0x15b   : > { %v669_v17 = vpop.permute.xlu1 %668  ;;  %v2579_v44 = vpop.permute.xlu0 %848 }
 0x15d   : > { %1155 = vperm.xlu1 %1615, %v1085_v45   ;;  %v3160_v45 = vld [vmem:[#allocation11_spill] sm:$0xff] }
 0x15f   : > { %v679_v54 = vpop.permute.xlu1 %678  ;;  %v2607_v15 = vpop.permute.xlu0 %896 }
 0x160   : > { %v686_v56 = vsel %vm682_vm1, %v669_v17, %v679_v54  ;;  %v691_v41 = vsel %vm682_vm1, %v679_v54, %v669_v17  ;;  %v432_v17 = vsel %vm425_vm5, %v3160_v45, %v3159_v40  ;;  %v3162_v54 = vld [vmem:[#allocation19_spill] sm:$0xff] }
 0x161   : > { %v703_v11 = vsel %vm2170_vm7, %v686_v56, 0.0  ;;  %v704_v57 = vsel %vm2193_vm9, %v691_v41, 0.0  ;;  %1165 = vperm.xlu1 %1615, %v1087_v49   ;;  %v3163_v56 = vld [vmem:[#allocation22_spill] sm:$0xff]  ;;  %v442_v51 = vsel %vm270_vm3, %v432_v17, 0.0 }
 0x162   : > { %v733_v58 = vmul.f32 %v2293_v9, %v703_v11  ;;  %v734_v12 = vmul.f32 %v2293_v9, %v704_v57  ;;  %v512_v26 = vsel %vm510_vm0, %v3162_v54, %v3163_v56  ;;  %v427_v57 = vsel %vm425_vm5, %v3159_v40, %v3160_v45 }
 0x163   : > { %v2595_v13 = vpop.permute.xlu1 %836  ;;  %v615_v45 = vsel %vm2181_vm8, %v599_v47, 0.0 }
 0x164   : > { %v743_v32 = vadd.f32 %v733_v58, %v658_v36  ;;  %v744_v23 = vadd.f32 %v734_v12, %v659_v53  ;;  %v388_v36 = vmul.f32 %v2357_v21, %v358_v34  ;;  %v3157_v53 = vld [vmem:[#allocation5_spill] sm:$0xff]  ;;  %v2631_v49 = vpop.permute.xlu0 %971  ;;  %v517_v21 = vsel %vm510_vm0, %v3163_v56, %v3162_v54  ;;  %v3169_v56 = vld [vmem:[#allocation20_spill] sm:$0xff] }
 0x165   : > { %v310_v43 = vmul.f32 %v3158_v63, %v3157_v53  ;;  %v3164_v58 = vld [vmem:[#allocation13_spill] sm:$0xff] }
 0x166   : > { %v2609_v9 = vadd.f32 %v820_v24, %v743_v32  ;;  %v2611_v55 = vadd.f32 %v821_v18, %v744_v23  ;;  %v398_v11 = vadd.f32 %v388_v36, %v311_v1  ;;  %v472_v12 = vmul.f32 %v3164_v58, %v442_v51  ;;  %v3167_v36 = vld [vmem:[#allocation14_spill] sm:$0xff]  ;;  %v3168_v1 = vld [vmem:[#allocation15_spill] sm:$0xff] }
 0x167   : > { %v2613_v25 = vpop.permute.xlu1 %846  ;;  %v397_v41 = vadd.f32 %v387_v16, %v310_v43  ;;  %v473_v18 = vmul.f32 %v3164_v58, %v427_v57  ;;  %v529_v32 = vsel %vm2201_vm10, %v517_v21, 0.0  ;;  %v530_v23 = vsel %vm2193_vm9, %v512_v26, 0.0  ;;  %v3172_v57 = vld [vmem:[#allocation30_spill] sm:$0xff] }
 0x168   : > { %v2663_v16 = vpop.permute.xlu0 %670  ;;  %v559_v53 = vmul.f32 %v3167_v36, %v529_v32  ;;  %v560_v63 = vmul.f32 %v3167_v36, %v530_v23  ;;  %v614_v43 = vsel %vm2147_vm4, %v604_v20, 0.0  ;;  %v699_v21 = vsel %vm2170_vm7, %v3169_v56, 0.0 }
 0x169   : > { %v482_v7 = vadd.f32 %v472_v12, %v397_v41  ;;  %v483_v34 = vadd.f32 %v473_v18, %v398_v11  ;;  %v644_v54 = vmul.f32 %v3168_v1, %v614_v43  ;;  %v3170_v41 = vld [vmem:[#allocation21_spill] sm:$0xff]  ;;  %v645_v26 = vmul.f32 %v3168_v1, %v615_v45 }
 0x16a   : > { %v700_v51 = vsel %vm2193_vm9, %v3170_v41, 0.0  ;;  %v3171_v11 = vld [vmem:[#allocation29_spill] sm:$0xff]  ;;  %v769_v23 = vsel %vm767_vm12, %v2544_v59, %v2553_v22  ;;  %v862_v56 = vsel %vm854_vm15, %v2579_v44, %v2567_v31 }
 0x16b   : > { %v2627_v27 = vpop.permute.xlu1 %975  ;;  %v569_v17 = vadd.f32 %v559_v53, %v482_v7  ;;  %v570_v19 = vadd.f32 %v560_v63, %v483_v34  ;;  %v860_v58 = vsel %vm854_vm15, %v3172_v57, %v3171_v11  ;;  %v774_v7 = vsel %vm767_vm12, %v2553_v22, %v2544_v59  ;;  %v3174_v63 = vld [vmem:[#allocation32_spill] sm:$0xff] }
 0x16c   : > { %v924_v12 = vpop.permute.xlu0 %923  ;;  %v855_v36 = vsel %vm854_vm15, %v3171_v11, %v3172_v57  ;;  %v786_v22 = vsel %vm2147_vm4, %v769_v23, 0.0 }
 0x16d   : > { %v654_v32 = vadd.f32 %v644_v54, %v569_v17  ;;  %v655_v20 = vadd.f32 %v645_v26, %v570_v19  ;;  %v3175_v17 = vld [vmem:[#allocation17_spill] sm:$0xff]  ;;  %v861_v19 = vsel %vm854_vm15, %v2613_v25, %v2595_v13  ;;  %v787_v54 = vsel %vm2339_vm14, %v774_v7, 0.0  ;;  %v3179_v7 = vld [vmem:[#allocation28_spill] sm:$0xff] }
 0x16e   : > { %v729_v59 = vmul.f32 %v3175_v17, %v699_v21  ;;  %v730_v38 = vmul.f32 %v3175_v17, %v700_v51  ;;  %v899_v51 = vmul.f32 %v2453_v46, %v855_v36 }
 0x16f   : > { %v2648_v24 = vpop.permute.xlu1 %979 }
 0x170   : > { %v739_v11 = vadd.f32 %v729_v59, %v654_v32  ;;  %v740_v57 = vadd.f32 %v730_v38, %v655_v20  ;;  %v3176_v32 = vld [vmem:[#allocation16_spill] sm:$0xff] }
 0x171   : > { %v816_v23 = vmul.f32 %v3176_v32, %v786_v22 }
 0x173   : > { %v826_v59 = vadd.f32 %v816_v23, %v739_v11 }
 0x174   : > { %v2669_v40 = vpop.permute.xlu1 %1018 }
 0x178   : > { %v499_v18 = vpop.permute.xlu1 %498 }
 0x179   : > { %v515_v29 = vsel %vm510_vm0, %v499_v18, %v2485_v61  ;;  %v520_v62 = vsel %vm510_vm0, %v2485_v61, %v499_v18  ;;  %v870_v61 = vsel %vm273_vm13, %v860_v58, 0.0  ;;  %v934_v58 = vpop.permute.xlu0 %933  ;;  %v941_v18 = vsel %vm939_vm2, %v2542_v37, %v2551_v60  ;;  %vm2761_vm0 = vmand %vm273_vm13, %vm2193_vm9 }
 0x17a   : > { %v535_v47 = vsel %vm2201_vm10, %v520_v62, 0.0  ;;  %v536_v34 = vsel %vm2193_vm9, %v515_v29, 0.0  ;;  %v900_v26 = vmul.f32 %v2453_v46, %v870_v61  ;;  %v872_v46 = vsel %vm273_vm13, %v861_v19, 0.0 }
 0x17b   : > { %v565_v43 = vmul.f32 %v3174_v63, %v535_v47  ;;  %v566_v45 = vmul.f32 %v3174_v63, %v536_v34  ;;  %v817_v29 = vmul.f32 %v3176_v32, %v787_v54  ;;  %v857_v62 = vsel %vm854_vm15, %v2567_v31, %v2579_v44 }
 0x17c   : > { %v752_v1 = vpop.permute.xlu1 %751  ;;  %v947_v20 = vsel %vm939_vm2, %v934_v58, %v924_v12  ;;  %v902_v34 = vmul.f32 %v3179_v7, %v872_v46  ;;  %v958_v63 = vsel %vm2170_vm7, %v941_v18, 0.0  ;;  %v903_v54 = vmul.f32 %v2558_v5, %v857_v62 }
 0x17d   : > { %v2728_v21 = vadd.f32 %v565_v43, %v2415_v28  ;;  %v2731_v41 = vadd.f32 %v566_v45, %v2417_v33  ;;  %v946_v28 = vsel %vm939_vm2, %v2551_v60, %v2542_v37  ;;  %v856_v33 = vsel %vm854_vm15, %v2595_v13, %v2613_v25  ;;  %v3180_v43 = vld [vmem:[#allocation23_spill] sm:$0xff]  ;;  %v1057_v60 = vld [vmem:[%s3074_s3 + $0x8] sm:$0xff] }
 0x17e   : > { %v874_v37 = vsel %vm273_vm13, %v862_v56, 0.0  ;;  %v942_v25 = vsel %vm939_vm2, %v924_v12, %v934_v58  ;;  %v901_v47 = vmul.f32 %v3179_v7, %v856_v33  ;;  %v959_v12 = vsel %vm2761_vm0, %v946_v28, 0.0 }
 0x17f   : > { %v827_v38 = vadd.f32 %v817_v29, %v740_v57  ;;  %v960_v22 = vsel %vm2170_vm7, %v942_v25, 0.0  ;;  %v961_v19 = vsel %vm2761_vm0, %v947_v20, 0.0  ;;  %v904_v56 = vmul.f32 %v2558_v5, %v874_v37 }
 0x180   : > { %v762_v13 = vpop.permute.xlu1 %761  ;;  %v988_v28 = vmul.f32 %v2631_v49, %v958_v63  ;;  %v989_v11 = vmul.f32 %v2631_v49, %v959_v12  ;;  %v911_v57 = vadd.f32 %v901_v47, %v826_v59  ;;  %v990_v46 = vmul.f32 %v2627_v27, %v960_v22 }
 0x181   : > { %v770_v31 = vsel %vm767_vm12, %v752_v1, %v762_v13  ;;  %v775_v44 = vsel %vm767_vm12, %v762_v13, %v752_v1  ;;  %v912_v33 = vadd.f32 %v902_v34, %v827_v38  ;;  %v991_v32 = vmul.f32 %v2627_v27, %v961_v19 }
 0x182   : > { %v788_v36 = vsel %vm2147_vm4, %v770_v31, 0.0  ;;  %v789_v61 = vsel %vm2339_vm14, %v775_v44, 0.0  ;;  %v909_v37 = vadd.f32 %v899_v51, %v2395_v3  ;;  %v910_v49 = vadd.f32 %v900_v26, %v2397_v48 }
 0x183   : > { %v818_v45 = vmul.f32 %v3180_v43, %v788_v36  ;;  %v819_v17 = vmul.f32 %v3180_v43, %v789_v61  ;;  %v998_v20 = vadd.f32 %v988_v28, %v911_v57  ;;  %v999_v31 = vadd.f32 %v989_v11, %v912_v33 }
 0x184   : > { %v920_v1 = vpop.permute.xlu1 %919 }
 0x185   : > { %v828_v58 = vadd.f32 %v818_v45, %v2525_v6  ;;  %v829_v18 = vadd.f32 %v819_v17, %v2527_v2  ;;  %v1038_v34 = vadd.f32 %v2669_v40, %v998_v20  ;;  %v1039_v3 = vadd.f32 %v2669_v40, %v999_v31 }
 0x187   : > { %v913_v23 = vadd.f32 %v903_v54, %v828_v58  ;;  %v914_v29 = vadd.f32 %v904_v56, %v829_v18  ;;  %v1048_v63 = vmax.f32 %v1038_v34, 0.0  ;;  %v1049_v12 = vmax.f32 %v1039_v3, 0.0 }
 0x188   : > { %v930_v13 = vpop.permute.xlu1 %929 }
 0x189   : > { %v940_v5 = vsel %vm939_vm2, %v920_v1, %v930_v13  ;;  %v945_v6 = vsel %vm939_vm2, %v930_v13, %v920_v1  ;;  %v1000_v2 = vadd.f32 %v990_v46, %v913_v23  ;;  %v1001_v62 = vadd.f32 %v991_v32, %v914_v29 }
 0x18a   : > { %v956_v25 = vsel %vm2170_vm7, %v940_v5, 0.0  ;;  %v957_v27 = vsel %vm2761_vm0, %v945_v6, 0.0 }
 0x18b   : > { %v986_v44 = vmul.f32 %v2455_v42, %v956_v25  ;;  %v987_v7 = vmul.f32 %v2455_v42, %v957_v27 }
 0x18c   : > { %v2809_v47 = vpop.permute.xlu1 %811 }
 0x18d   : > { %v996_v51 = vadd.f32 %v986_v44, %v909_v37  ;;  %v997_v48 = vadd.f32 %v987_v7, %v910_v49  ;;  %v984_v49 = vpop.permute.xlu0 %983 }
 0x18f   : > { %v1037_v26 = vadd.f32 %v2413_v10, %v997_v48  ;;  %v1036_v36 = vadd.f32 %v2413_v10, %v996_v51 }
 0x190   : > { %v596_v61 = vpop.permute.xlu1 %595 }
 0x191   : > { %v1047_v43 = vmax.f32 %v1037_v26, 0.0  ;;  %v1046_v45 = vmax.f32 %v1036_v36, 0.0  ;;  %v607_v5 = vsel %vm597_vm11, %v596_v61, %v2560_v35  ;;  %v602_v25 = vsel %vm597_vm11, %v2560_v35, %v596_v61  ;;  %v3181_v26 = vld [vmem:[#allocation27_spill] sm:$0xff] }
 0x192   : > { %v621_v51 = vsel %vm2181_vm8, %v602_v25, 0.0  ;;  %v1066_v25 = vld [vmem:[%s3074_s3 + $0x50] sm:$0xff] }
 0x193   : > { %v1514_v17 = vpack.c.bf16 %v1049_v12, %v1047_v43  ;;  %v1516_v59 = vpack.c.bf16 %v1048_v63, %v1046_v45  ;;  %v843_v43 = vpop.permute.xlu0 %842  ;;  %v651_v4 = vmul.f32 %v3181_v26, %v621_v51 }
 0x194   : > { %v841_v42 = vpop.permute.xlu1 %840 }
 0x195   : > { %1515 = vmatprep.subr.bf16.mxu0 %v1514_v17  ;;  %1522 = vmatprep.subr.bf16.mxu1 %v1514_v17 }
 0x196   : > { %1517 = vmatpush1.bf16.msra.mxu0 %v1516_v59  ;;  %1525 = vmatpush1.bf16.msra.mxu1 %v1516_v59  ;;  %v3182_v59 = vld [vmem:[#allocation31_spill] sm:$0xff] }
 0x198   : > { %v851_v38 = vpop.permute.xlu1 %850 }
 0x199   : > { %v858_v40 = vsel %vm854_vm15, %v841_v42, %v851_v38  ;;  %v863_v22 = vsel %vm854_vm15, %v851_v38, %v841_v42 }
 0x19a   : > { %v876_v10 = vsel %vm273_vm13, %v863_v22, 0.0  ;;  %v905_v19 = vmul.f32 %v2565_v0, %v858_v40 }
 0x19b   : > { %v906_v1 = vmul.f32 %v2565_v0, %v876_v10 }
 0x19c   : > { %v915_v54 = vadd.f32 %v905_v19, %v2609_v9  ;;  %v1024_v56 = vpop.permute.xlu1 %1023 }
 0x19d   : > { %v916_v58 = vadd.f32 %v906_v1, %v2611_v55  ;;  %v1040_v23 = vadd.f32 %v1024_v56, %v1000_v2  ;;  %v1041_v29 = vadd.f32 %v1024_v56, %v1001_v62  ;;  %v620_v2 = vsel %vm2147_vm4, %v607_v5, 0.0 }
 0x19e   : > { %v650_v36 = vmul.f32 %v3181_v26, %v620_v2  ;;  %v1068_v2 = vld [vmem:[%s3074_s3 + $0x60] sm:$0xff] }
 0x19f   : > { %v1050_v62 = vmax.f32 %v1040_v23, 0.0  ;;  %v1051_v31 = vmax.f32 %v1041_v29, 0.0  ;;  %v1034_v23 = vpop.permute.xlu0 %1033 }
 0x1a0   : > { %v1029_v18 = vpop.permute.xlu1 %1028  ;;  %v660_v50 = vadd.f32 %v650_v36, %v2728_v21 }
 0x1a4   : > { %v681_v28 = vpop.permute.xlu1 %680 }
 0x1a5   : > { %v687_v27 = vsel %vm682_vm1, %v2663_v16, %v681_v28  ;;  %v692_v7 = vsel %vm682_vm1, %v681_v28, %v2663_v16  ;;  %vm1168_vm1 = vcmask 326656  }
 0x1a6   : > { %v705_v48 = vsel %vm2170_vm7, %v687_v27, 0.0  ;;  %v706_v16 = vsel %vm2193_vm9, %v692_v7, 0.0  ;;  %v1059_v27 = vld [vmem:[%s3074_s3 + $0x18] sm:$0xff]  ;;  %v1070_v7 = vld [vmem:[%s3074_s3 + $0x70] sm:$0xff] }
 0x1a7   : > { %v735_v42 = vmul.f32 %v3182_v59, %v705_v48  ;;  %v736_v22 = vmul.f32 %v3182_v59, %v706_v16 }
 0x1a8   : > { %v926_v11 = vpop.permute.xlu1 %925 }
 0x1a9   : > { %v745_v39 = vadd.f32 %v735_v42, %v660_v50 }
 0x1ac   : > { %v936_v57 = vpop.permute.xlu1 %935 }
 0x1ad   : > { %v943_v33 = vsel %vm939_vm2, %v926_v11, %v936_v57  ;;  %v948_v46 = vsel %vm939_vm2, %v936_v57, %v926_v11 }
 0x1ae   : > { %v962_v32 = vsel %vm2170_vm7, %v943_v33, 0.0  ;;  %v963_v0 = vsel %vm2761_vm0, %v948_v46, 0.0 }
 0x1af   : > { %v992_v9 = vmul.f32 %v2648_v24, %v962_v32  ;;  %v993_v55 = vmul.f32 %v2648_v24, %v963_v0 }
 0x1b0   : > { %v756_v13 = vpop.permute.xlu1 %755 }
 0x1b1   : > { %v1002_v6 = vadd.f32 %v992_v9, %v915_v54  ;;  %v1003_v37 = vadd.f32 %v993_v55, %v916_v58  ;;  %v661_v54 = vadd.f32 %v651_v4, %v2731_v41 }
 0x1b3   : > { %v1043_v20 = vadd.f32 %v1029_v18, %v1003_v37  ;;  %v1042_v24 = vadd.f32 %v1029_v18, %v1002_v6  ;;  %v746_v58 = vadd.f32 %v736_v22, %v661_v54  ;;  %v1065_v37 = vld [vmem:[%s3074_s3 + $0x48] sm:$0xff] }
 0x1b4   : > { %v766_v44 = vpop.permute.xlu1 %765 }
 0x1b5   : > { %v772_v34 = vsel %vm767_vm12, %v756_v13, %v766_v44  ;;  %v1053_v35 = vmax.f32 %v1043_v20, 0.0  ;;  %v1052_v3 = vmax.f32 %v1042_v24, 0.0  ;;  %v777_v61 = vsel %vm767_vm12, %v766_v44, %v756_v13  ;;  %v1067_v20 = vld [vmem:[%s3074_s3 + $0x58] sm:$0xff]  ;;  %v1060_v24 = vld [vmem:[%s3074_s3 + $0x20] sm:$0xff]  ;;  %v1062_v44 = vld [vmem:[%s3074_s3 + $0x30] sm:$0xff] }
 0x1b6   : > { %v792_v45 = vsel %vm2147_vm4, %v772_v34, 0.0  ;;  %v793_v40 = vsel %vm2339_vm14, %v777_v61, 0.0  ;;  %v1063_v34 = vld [vmem:[%s3074_s3 + $0x38] sm:$0xff] }
 0x1b7   : > { %v1518_v63 = vpack.c.bf16 %v1053_v35, %v1051_v31  ;;  %v1520_v12 = vpack.c.bf16 %v1052_v3, %v1050_v62  ;;  %v822_v30 = vmul.f32 %v2809_v47, %v792_v45  ;;  %v823_v56 = vmul.f32 %v2809_v47, %v793_v40  ;;  %v1061_v62 = vld [vmem:[%s3074_s3 + $0x28] sm:$0xff]  ;;  %v1071_v35 = vld [vmem:[%s3074_s3 + $0x78] sm:$0xff]  ;;  %v1091_v3 = vpop.permute.xlu0 %1090 }
 0x1b8   : > { %v853_v17 = vpop.permute.xlu1 %852  ;;  %v1069_v31 = vld [vmem:[%s3074_s3 + $0x68] sm:$0xff] }
 0x1b9   : > { %v864_v38 = vsel %vm854_vm15, %v853_v17, %v843_v43  ;;  %1519 = vmatprep.subr.bf16.mxu0 %v1518_v63  ;;  %1523 = vmatprep.subr.bf16.mxu1 %v1518_v63  ;;  %v859_v10 = vsel %vm854_vm15, %v843_v43, %v853_v17  ;;  %v832_v18 = vadd.f32 %v822_v30, %v745_v39 }
 0x1ba   : > { %1521 = vmatpush1.bf16.msra.mxu0 %v1520_v12  ;;  %1526 = vmatpush1.bf16.msra.mxu1 %v1520_v12  ;;  %v878_v19 = vsel %vm273_vm13, %v864_v38, 0.0  ;;  %v907_v21 = vmul.f32 %v2607_v15, %v859_v10  ;;  %v833_v57 = vadd.f32 %v823_v56, %v746_v58 }
 0x1bb   : > { %v908_v28 = vmul.f32 %v2607_v15, %v878_v19  ;;  %v1101_v48 = vpop.permute.xlu0 %1100 }
 0x1bc   : > { %v928_v1 = vpop.permute.xlu1 %927  ;;  %v917_v46 = vadd.f32 %v907_v21, %v832_v18 }
 0x1bd   : > { %v918_v32 = vadd.f32 %v908_v28, %v833_v57 }
 0x1bf   : > { %v2965_v36 = vpop.permute.xlu0 %1110 }
 0x1c0   : > { %v938_v11 = vpop.permute.xlu1 %937 }
 0x1c1   : > { %v944_v33 = vsel %vm939_vm2, %v928_v1, %v938_v11  ;;  %v949_v53 = vsel %vm939_vm2, %v938_v11, %v928_v1 }
 0x1c2   : > { %v964_v41 = vsel %vm2170_vm7, %v944_v33, 0.0  ;;  %v965_v47 = vsel %vm2761_vm0, %v949_v53, 0.0 }
 0x1c3   : > { %v994_v0 = vmul.f32 %v984_v49, %v964_v41  ;;  %v995_v9 = vmul.f32 %v984_v49, %v965_v47  ;;  %v1058_v49 = vld [vmem:[%s3074_s3 + $0x10] sm:$0xff] }
 0x1c4   : > { %v1096_v51 = vpop.permute.xlu1 %1095 }
 0x1c5   : > { %v1004_v55 = vadd.f32 %v994_v0, %v917_v46  ;;  %v1005_v15 = vadd.f32 %v995_v9, %v918_v32 }
 0x1c7   : > { %v1045_v29 = vadd.f32 %v1034_v23, %v1005_v15  ;;  %v1044_v13 = vadd.f32 %v1034_v23, %v1004_v55 }
 0x1c8   : > { %v1106_v26 = vpop.permute.xlu1 %1105 }
 0x1c9   : > { %v1055_v5 = vmax.f32 %v1045_v29, 0.0  ;;  %v1054_v6 = vmax.f32 %v1044_v13, 0.0 }
 0x1cb   : > { %1225 = vmatprep.subr.mxu0 %v1055_v5  ;;  %1524 = vmatprep.subr.mxu1 %v1055_v5 }
 0x1cc   : > { %1226 = vmatpush1.msra.mxu0 %v1054_v6  ;;  %1527 = vmatpush1.msra.mxu1 %v1054_v6  ;;  %v2967_v61 = vpop.permute.xlu1 %1115 }
 0x1cd   : > { %1492 = vmatmul.mubr.msk.f32.vlgmr.msra.gmra.mrb[0].mxu0 %vm1168_vm1, %v1056_v8  ;;  %1500 = vmatmul.mubr.msk.f32.vlgmr.msra.gmra.mrb[0].mxu1 %vm1168_vm1, %v1064_v14 }
 0x1ce   : > { %1287 = vmatprep.mubr.f32.mxu0 %v1698_v52  ;;  %1335 = vmatprep.mubr.f32.mxu1 %v1698_v52 }
 0x1d0   : > { %v2972_v63 = vpop.permute.xlu1 %1125 }
 0x1d1   : > { %1493 = vmatmul.mubr.msk.f32.gmra.mrb[2].mxu0 %vm1168_vm1, %v1057_v60  ;;  %1501 = vmatmul.mubr.msk.f32.gmra.mrb[2].mxu1 %vm1168_vm1, %v1065_v37 }
 0x1d2   : > { %1293 = vmatprep.mubr.f32.mxu0 %v1698_v52  ;;  %1341 = vmatprep.mubr.f32.mxu1 %v1698_v52 }
 0x1d4   : > { %v1136_v40 = vpop.permute.xlu1 %1135 }
 0x1d5   : > { %1494 = vmatmul.mubr.msk.f32.gmra.mrb[4].mxu0 %vm1168_vm1, %v1058_v49  ;;  %1502 = vmatmul.mubr.msk.f32.gmra.mrb[4].mxu1 %vm1168_vm1, %v1066_v25 }
 0x1d6   : > { %1299 = vmatprep.mubr.f32.mxu0 %v1698_v52  ;;  %1347 = vmatprep.mubr.f32.mxu1 %v1698_v52 }
 0x1d8   : > { %v1146_v41 = vpop.permute.xlu1 %1145 }
 0x1d9   : > { %1495 = vmatmul.mubr.msk.f32.gmra.mrb[6].mxu0 %vm1168_vm1, %v1059_v27  ;;  %1503 = vmatmul.mubr.msk.f32.gmra.mrb[6].mxu1 %vm1168_vm1, %v1067_v20 }
 0x1da   : > { %1305 = vmatprep.mubr.f32.mxu0 %v1698_v52  ;;  %1353 = vmatprep.mubr.f32.mxu1 %v1698_v52 }
 0x1dc   : > { %v1156_v25 = vpop.permute.xlu1 %1155 }
 0x1dd   : > { %1496 = vmatmul.mubr.msk.f32.gmra.mrb[8].mxu0 %vm1168_vm1, %v1060_v24  ;;  %1504 = vmatmul.mubr.msk.f32.gmra.mrb[8].mxu1 %vm1168_vm1, %v1068_v2 }
 0x1de   : > { %1311 = vmatprep.mubr.f32.mxu0 %v1698_v52  ;;  %1359 = vmatprep.mubr.f32.mxu1 %v1698_v52 }
 0x1e1   : > { %1497 = vmatmul.mubr.msk.f32.gmra.mrb[10].mxu0 %vm1168_vm1, %v1061_v62  ;;  %1505 = vmatmul.mubr.msk.f32.gmra.mrb[10].mxu1 %vm1168_vm1, %v1069_v31 }
 0x1e2   : > { %1317 = vmatprep.mubr.f32.mxu0 %v1698_v52  ;;  %1365 = vmatprep.mubr.f32.mxu1 %v1698_v52 }
 0x1e5   : > { %1498 = vmatmul.mubr.msk.f32.gmra.mrb[12].mxu0 %vm1168_vm1, %v1062_v44  ;;  %1506 = vmatmul.mubr.msk.f32.gmra.mrb[12].mxu1 %vm1168_vm1, %v1070_v7 }
 0x1e6   : > { %1323 = vmatprep.mubr.f32.mxu0 %v1698_v52  ;;  %1371 = vmatprep.mubr.f32.mxu1 %v1698_v52  ;;  %v2969_v52 = vpop.permute.xlu0 %1120 }
 0x1e9   : > { %1499 = vmatmul.mubr.msk.f32.gmra.mrb[14].mxu0 %vm1168_vm1, %v1063_v34  ;;  %1507 = vmatmul.mubr.msk.f32.gmra.mrb[14].mxu1 %vm1168_vm1, %v1071_v35 }
 0x1ea   : > { %v1131_v12 = vpop.permute.xlu0 %1130 }
 0x1ee   : > { %v1141_v56 = vpop.permute.xlu0 %1140 }
 0x1f2   : > { %v1151_v29 = vpop.permute.xlu0 %1150 }
 0x1f6   : > { %v1161_v34 = vpop.permute.xlu0 %1160 }
 0x2a0   : > { %v1283_v43 = vpop.f32.mrb[0].mxu0  ;;  %v1331_v16 = vpop.f32.mrb[0].mxu1 }
 0x2a1   : > { %v1284_v45 = vadd.f32 %v1283_v43, %v1091_v3  ;;  %v1332_v17 = vadd.f32 %v1331_v16, %v1131_v12  ;;  %v1285_v4 = vpop.f32.mrb[1].mxu0  ;;  %v1333_v59 = vpop.f32.mrb[1].mxu1 }
 0x2a2   : > { %v1286_v42 = vadd.f32 %v1285_v4, %v1091_v3  ;;  %v1334_v38 = vadd.f32 %v1333_v59, %v1131_v12  ;;  %v1166_v43 = vpop.permute.xlu1 %1165 }
 0x2a3   : > { %1378 = vst [vmem:[%s2976_s23] sm:$0xff] %v1284_v45  ;;  %1394 = vst [vmem:[%s2976_s23 + $0x80] sm:$0xff] %v1332_v17 }
 0x2a4   : > { %1379 = vst [vmem:[%s2976_s23 + $0x8] sm:$0xff] %v1286_v42  ;;  %1395 = vst [vmem:[%s2976_s23 + $0x88] sm:$0xff] %v1334_v38  ;;  %v1289_v50 = vpop.f32.mrb[2].mxu0  ;;  %v1337_v22 = vpop.f32.mrb[2].mxu1 }
 0x2a5   : > { %v1290_v30 = vadd.f32 %v1289_v50, %v1096_v51  ;;  %v1338_v10 = vadd.f32 %v1337_v22, %v1136_v40  ;;  %v1291_v19 = vpop.f32.mrb[3].mxu0  ;;  %v1339_v1 = vpop.f32.mrb[3].mxu1 }
 0x2a6   : > { %v1292_v54 = vadd.f32 %v1291_v19, %v1096_v51  ;;  %v1340_v39 = vadd.f32 %v1339_v1, %v1136_v40 }
 0x2a7   : > { %1380 = vst [vmem:[%s2976_s23 + $0x10] sm:$0xff] %v1290_v30  ;;  %1396 = vst [vmem:[%s2976_s23 + $0x90] sm:$0xff] %v1338_v10 }
 0x2a8   : > { %1381 = vst [vmem:[%s2976_s23 + $0x18] sm:$0xff] %v1292_v54  ;;  %1397 = vst [vmem:[%s2976_s23 + $0x98] sm:$0xff] %v1340_v39  ;;  %v1295_v58 = vpop.f32.mrb[4].mxu0  ;;  %v1343_v18 = vpop.f32.mrb[4].mxu1 }
 0x2a9   : > { %v1296_v21 = vadd.f32 %v1295_v58, %v1101_v48  ;;  %v1344_v28 = vadd.f32 %v1343_v18, %v1141_v56  ;;  %v1297_v11 = vpop.f32.mrb[5].mxu0  ;;  %v1345_v57 = vpop.f32.mrb[5].mxu1 }
 0x2aa   : > { %v1298_v33 = vadd.f32 %v1297_v11, %v1101_v48  ;;  %v1346_v53 = vadd.f32 %v1345_v57, %v1141_v56 }
 0x2ab   : > { %1382 = vst [vmem:[%s2976_s23 + $0x20] sm:$0xff] %v1296_v21  ;;  %1398 = vst [vmem:[%s2976_s23 + $0xa0] sm:$0xff] %v1344_v28 }
 0x2ac   : > { %1383 = vst [vmem:[%s2976_s23 + $0x28] sm:$0xff] %v1298_v33  ;;  %1399 = vst [vmem:[%s2976_s23 + $0xa8] sm:$0xff] %v1346_v53  ;;  %v1301_v47 = vpop.f32.mrb[6].mxu0  ;;  %v1349_v46 = vpop.f32.mrb[6].mxu1 }
 0x2ad   : > { %v1302_v32 = vadd.f32 %v1301_v47, %v1106_v26  ;;  %v1350_v0 = vadd.f32 %v1349_v46, %v1146_v41  ;;  %v1303_v9 = vpop.f32.mrb[7].mxu0  ;;  %v1351_v55 = vpop.f32.mrb[7].mxu1 }
 0x2ae   : > { %v1304_v15 = vadd.f32 %v1303_v9, %v1106_v26  ;;  %v1352_v23 = vadd.f32 %v1351_v55, %v1146_v41 }
 0x2af   : > { %1384 = vst [vmem:[%s2976_s23 + $0x30] sm:$0xff] %v1302_v32  ;;  %1400 = vst [vmem:[%s2976_s23 + $0xb0] sm:$0xff] %v1350_v0 }
 0x2b0   : > { %1385 = vst [vmem:[%s2976_s23 + $0x38] sm:$0xff] %v1304_v15  ;;  %1401 = vst [vmem:[%s2976_s23 + $0xb8] sm:$0xff] %v1352_v23  ;;  %v1307_v13 = vpop.f32.mrb[8].mxu0  ;;  %v1355_v5 = vpop.f32.mrb[8].mxu1 }
 0x2b1   : > { %v1308_v6 = vadd.f32 %v1307_v13, %v2965_v36  ;;  %v1356_v8 = vadd.f32 %v1355_v5, %v1151_v29  ;;  %v1309_v14 = vpop.f32.mrb[9].mxu0  ;;  %v1357_v60 = vpop.f32.mrb[9].mxu1 }
 0x2b2   : > { %v1310_v37 = vadd.f32 %v1309_v14, %v2965_v36  ;;  %v1358_v49 = vadd.f32 %v1357_v60, %v1151_v29 }
 0x2b3   : > { %1386 = vst [vmem:[%s2976_s23 + $0x40] sm:$0xff] %v1308_v6  ;;  %1402 = vst [vmem:[%s2976_s23 + $0xc0] sm:$0xff] %v1356_v8 }
 0x2b4   : > { %1387 = vst [vmem:[%s2976_s23 + $0x48] sm:$0xff] %v1310_v37  ;;  %1403 = vst [vmem:[%s2976_s23 + $0xc8] sm:$0xff] %v1358_v49  ;;  %v1313_v27 = vpop.f32.mrb[10].mxu0  ;;  %v1361_v20 = vpop.f32.mrb[10].mxu1 }
 0x2b5   : > { %v1314_v24 = vadd.f32 %v1313_v27, %v2967_v61  ;;  %v1362_v2 = vadd.f32 %v1361_v20, %v1156_v25  ;;  %v1315_v62 = vpop.f32.mrb[11].mxu0  ;;  %v1363_v31 = vpop.f32.mrb[11].mxu1 }
 0x2b6   : > { %v1316_v44 = vadd.f32 %v1315_v62, %v2967_v61  ;;  %v1364_v7 = vadd.f32 %v1363_v31, %v1156_v25 }
 0x2b7   : > { %1388 = vst [vmem:[%s2976_s23 + $0x50] sm:$0xff] %v1314_v24  ;;  %1404 = vst [vmem:[%s2976_s23 + $0xd0] sm:$0xff] %v1362_v2 }
 0x2b8   : > { %1389 = vst [vmem:[%s2976_s23 + $0x58] sm:$0xff] %v1316_v44  ;;  %1405 = vst [vmem:[%s2976_s23 + $0xd8] sm:$0xff] %v1364_v7  ;;  %v1319_v35 = vpop.f32.mrb[12].mxu0  ;;  %v1367_v3 = vpop.f32.mrb[12].mxu1 }
 0x2b9   : > { %v1320_v51 = vadd.f32 %v1319_v35, %v2969_v52  ;;  %v1368_v48 = vadd.f32 %v1367_v3, %v1161_v34  ;;  %v1321_v26 = vpop.f32.mrb[13].mxu0  ;;  %v1369_v36 = vpop.f32.mrb[13].mxu1 }
 0x2ba   : > { %v1322_v61 = vadd.f32 %v1321_v26, %v2969_v52  ;;  %v1370_v12 = vadd.f32 %v1369_v36, %v1161_v34 }
 0x2bb   : > { %1390 = vst [vmem:[%s2976_s23 + $0x60] sm:$0xff] %v1320_v51  ;;  %1406 = vst [vmem:[%s2976_s23 + $0xe0] sm:$0xff] %v1368_v48 }
 0x2bc   : > { %1391 = vst [vmem:[%s2976_s23 + $0x68] sm:$0xff] %v1322_v61  ;;  %1407 = vst [vmem:[%s2976_s23 + $0xe8] sm:$0xff] %v1370_v12  ;;  %v1325_v16 = vpop.f32.mrb[14].mxu0  ;;  %v1373_v45 = vpop.f32.mrb[14].mxu1 }
 0x2bd   : > { %v1326_v17 = vadd.f32 %v1325_v16, %v2972_v63  ;;  %v1374_v4 = vadd.f32 %v1373_v45, %v1166_v43  ;;  %v1327_v52 = vpop.f32.mrb[15].mxu0  ;;  %v1375_v59 = vpop.f32.mrb[15].mxu1 }
 0x2be   : > { %v1328_v42 = vadd.f32 %v1327_v52, %v2972_v63  ;;  %v1376_v38 = vadd.f32 %v1375_v59, %v1166_v43 }
 0x2bf   : > { %1392 = vst [vmem:[%s2976_s23 + $0x70] sm:$0xff] %v1326_v17  ;;  %1408 = vst [vmem:[%s2976_s23 + $0xf0] sm:$0xff] %v1374_v4 }
 0x2c0   : > { %1393 = vst [vmem:[%s2976_s23 + $0x78] sm:$0xff] %v1328_v42  ;;  %1409 = vst [vmem:[%s2976_s23 + $0xf8] sm:$0xff] %v1376_v38 }
 0x2c1   : > { %1630 = shalt.err (!%p1627_p3)
}
 0x2c2   : > { %s1631_s8 = scalar_lea.hbm %s3018_s6, 4096  ;;  %s1635_s13 = scalar_lea.hbm %s3076_s5, 8192 }
 0x2c3   : > { %p1632_p4 = scmp.ne.s32.totalorder %s3018_s6, %s1631_s8  ;;  %p1636_p9 = scmp.lt.u32.totalorder %s3018_s6, %s3076_s5 }
 0x2c4   : > { %p1637_p10 = scmp.lt.u32.totalorder %s1635_s13, %s1631_s8  ;;  %p1639_p12 = scmp.lt.u32.totalorder %s1631_s8, %s3018_s6 }
 0x2c5   : > { %p1633_p7 = pnand %p1632_p4, %p1769_p5 }
 0x2c6   : > { %p1638_p11 = por %p1637_p10, %p1636_p9 }
 0x2c7   : > { %p1634_p8 = pneg %p1633_p7 }
 0x2c8   : > { %p1640_p13 = por %p1639_p12, %p1638_p11 }
 0x2ca   : > { %p1641_p0 = pnand %p1640_p13, %p1634_p8 }
 0x2cc   : > { %1644 = shalt.err (!%p1641_p0)
}
 0x2cd   : > { %s1700_s25 = smov 256  }
 0x2ce   : > { %1529 = dma.vmem_to_hbm [thread:$0]  (%p1769_p5), %s3021_s7, 4096, %s3018_s6, %s3029_s11, %s1700_s25, %s1700_s25, %s1685_s30  }
 0x2cf PF: > { %p1535_p1 = scmp.ge.s32.totalorder %s1679_s21, 2  ;;  %s1439_s22 = sand.u32 1, %s1667_s18  }
 0x2d0   : > { %s1440_s26 = scalar_lea.sflag [#allocation3], %s1439_s22 }
 0x2d1   : > { %p1532_p2 = pnand %p1535_p1, %p1773_p6 }
 0x2d3   : > { %1662 = dma.done.wait (!%p1532_p2), %s1440_s26, 4096  }
 0x2d4   : > { %1664 = vsyncadd (!%p1532_p2), %s1440_s26, 4294963200  ;;  %p15_p3 = scmp.ge.s32.totalorder %s1756_s24, 4   ;;  %s3183_s18 = smov %s1671_s19 }
 0x2d5   : > { %s3184_s19 = smov %s1675_s20  ;;  %s3185_s20 = smov %s1767_s27 }
 0x2d6   : > { %s3186_s21 = smov %s1756_s24  ;;  %17 = sbr.rel (!%p15_p3) target bundleno = 3 (0x3), region = 75 }
 0x2dd   :  { %1445 = vsyncpa [#allocation3], 1 }
 0x2de   :  { %1447 = vsyncpa [#allocation3 + $0x1], 1 }

</bundles_post_ra>
